<compile_context>
chip_gen: v7x
topology: tpu7x:2x2x1
jax: 0.10.0
libtpu: 0.0.40
codegen_flags: <defaults>
</compile_context>

<pallas_src>
import jax
import jax.numpy as jnp
from jax import lax
from jax.experimental import pallas as pl
from jax.experimental.pallas import tpu as pltpu


def gru_seq_kernel(tok_ref,      # (L, 1)   int32  token ids
                   emb_ref,      # (V, H)   f32    embedding table (VMEM-resident)
                   h0_ref,       # (1, H)   f32    initial hidden state
                   w_ih_ref,     # (H, 3H)  bf16
                   w_hh_ref,     # (H, 3H)  bf16
                   b_ih_ref,     # (1, 3H)  f32
                   b_hh_ref,     # (1, 3H)  f32
                   out_ref,      # (L, H)   f32    per-step hidden states
                   gi_ref,       # (L, 3H)  f32    VMEM scratch: hoisted input projection
                   ):
    L, H = out_ref.shape
    V = emb_ref.shape[0]

    # ---- one-shot embedding gather: one-hot (L, V) @ (V, H), exact row select ----
    tok = tok_ref[...]                                            # (L, 1) int32
    col = lax.broadcasted_iota(jnp.int32, (L, V), 1)              # (L, V)
    onehot = (col == tok).astype(jnp.float32)                     # (L, V)
    x = jnp.dot(onehot, emb_ref[...],
                preferred_element_type=jnp.float32)               # (L, H) == E[tok]
    x = x.astype(jnp.bfloat16)                                    # MXU input dtype

    # ---- input projection hoisted out of the recurrence (one batched matmul) ----
    gi = jnp.dot(x, w_ih_ref[...],
                 preferred_element_type=jnp.float32) + b_ih_ref[...]     # (L, 3H) f32
    b_hh = b_hh_ref[...]                                          # (1, 3H) f32
    # Fold b_hh's r/z columns into GI; only the n-slice of b_hh is needed per step.
    gi_ref[:, :2 * H] = gi[:, :2 * H] + b_hh[:, :2 * H]
    gi_ref[:, 2 * H:] = gi[:, 2 * H:]
    b_hn = b_hh[:, 2 * H:]                                        # (1, H)

    w_hh = w_hh_ref[...]                                          # resident bf16 weights

    # ---- serial GRU recurrence: only h @ W_hh remains on the critical path ----
    def step(t, h):                                               # h: (1, H) f32
        g = gi_ref[pl.ds(t, 1), :]                                # (1, 3H) f32
        gh = jnp.dot(h.astype(jnp.bfloat16), w_hh,
                     preferred_element_type=jnp.float32)          # (1, 3H) f32
        # Gate order along 3H is [r, z, n], matching torch.nn.GRU.
        r = jax.nn.sigmoid(g[:, 0:H] + gh[:, 0:H])
        z = jax.nn.sigmoid(g[:, H:2 * H] + gh[:, H:2 * H])
        n = jnp.tanh(g[:, 2 * H:] + r * (gh[:, 2 * H:] + b_hn))
        h_new = (1.0 - z) * n + z * h                             # f32 gate math
        out_ref[pl.ds(t, 1), :] = h_new.astype(out_ref.dtype)
        return h_new

    lax.fori_loop(0, L, step, h0_ref[...].astype(jnp.float32), unroll=True)


def encoder_rnn_forward(tokens, hidden, params):
    """Run the EncoderRNN over a token sequence in ONE pallas_call (no grid).

    tokens : int32 (L,)        -- input token ids (L=1 reproduces module.forward)
    hidden : f32   (1, 1, H)   -- initial hidden state
    returns (outputs, hidden): outputs f32 (L, 1, H), hidden f32 (1, 1, H).
    """
    E, W_ih, W_hh, b_ih, b_hh = (params["embedding"], params["w_ih"],
                                 params["w_hh"], params["b_ih"], params["b_hh"])
    V, H = E.shape
    L = tokens.shape[0]
    tok2d = tokens.reshape(L, 1).astype(jnp.int32)
    h2d = hidden.reshape(1, H).astype(jnp.float32)

    vmem_spec = pl.BlockSpec(memory_space=pltpu.MemorySpace.VMEM)
    outs = pl.pallas_call(
        gru_seq_kernel,
        out_shape=jax.ShapeDtypeStruct((L, H), jnp.float32),
        in_specs=[vmem_spec] * 7,
        out_specs=vmem_spec,
        scratch_shapes=[pltpu.VMEM((L, 3 * H), jnp.float32)],
        compiler_params=pltpu.CompilerParams(
            vmem_limit_bytes=32 * 1024 * 1024),
    )(tok2d, E, h2d, W_ih, W_hh, b_ih, b_hh)

    outputs = outs.reshape(L, 1, H)              # per-step GRU outputs (1-layer GRU)
    final_hidden = outs[L - 1].reshape(1, 1, H)
    return outputs, final_hidden


def init_params(key, input_size, hidden_size):
    k_emb, k_wi, k_wh, k_bi, k_bh = jax.random.split(key, 5)
    scale = hidden_size ** -0.5
    return {
        "embedding": jax.random.normal(k_emb, (input_size, hidden_size), jnp.float32),
        # Stored as (H, 3H): column blocks are [r | z | n]; bf16 MXU inputs.
        "w_ih": jax.random.uniform(k_wi, (hidden_size, 3 * hidden_size),
                                   jnp.float32, -scale, scale).astype(jnp.bfloat16),
        "w_hh": jax.random.uniform(k_wh, (hidden_size, 3 * hidden_size),
                                   jnp.float32, -scale, scale).astype(jnp.bfloat16),
        "b_ih": jax.random.uniform(k_bi, (1, 3 * hidden_size),
                                   jnp.float32, -scale, scale),
        "b_hh": jax.random.uniform(k_bh, (1, 3 * hidden_size),
                                   jnp.float32, -scale, scale),
    }


def reference_forward(tokens, hidden, params):
    """Pure-JAX reference (same bf16-input / f32-accumulate math), via lax.scan."""
    E, W_ih, W_hh, b_ih, b_hh = (params["embedding"], params["w_ih"],
                                 params["w_hh"], params["b_ih"], params["b_hh"])
    H = hidden.shape[-1]

    def step(h, tok):
        x = E[tok][None, :].astype(jnp.bfloat16)
        gi = jnp.dot(x, W_ih, preferred_element_type=jnp.float32) + b_ih
        gh = jnp.dot(h.astype(jnp.bfloat16), W_hh,
                     preferred_element_type=jnp.float32) + b_hh
        r = jax.nn.sigmoid(gi[:, :H] + gh[:, :H])
        z = jax.nn.sigmoid(gi[:, H:2 * H] + gh[:, H:2 * H])
        n = jnp.tanh(gi[:, 2 * H:] + r * gh[:, 2 * H:])
        h_new = (1.0 - z) * n + z * h
        return h_new, h_new

    h0 = hidden.reshape(1, H).astype(jnp.float32)
    h_final, outs = jax.lax.scan(step, h0, tokens)
    return outs, h_final.reshape(1, 1, H)        # outs: (L, 1, H)


if __name__ == "__main__":
    input_size = 128     # vocab size (lane-aligned for the one-hot gather)
    hidden_size = 128    # lane-aligned small hidden size
    seq_len = 8

    key = jax.random.PRNGKey(0)
    k_params, k_tok = jax.random.split(key)
    params = init_params(k_params, input_size, hidden_size)

    tokens = jax.random.randint(k_tok, (seq_len,), 0, input_size, dtype=jnp.int32)
    hidden0 = jnp.zeros((1, 1, hidden_size), dtype=jnp.float32)   # initHidden()

    out, hid = encoder_rnn_forward(tokens, hidden0, params)
    out = jax.block_until_ready(out)
    hid = jax.block_until_ready(hid)

    ref_out, ref_hid = reference_forward(tokens, hidden0, params)
    assert out.shape == (seq_len, 1, hidden_size)
    assert hid.shape == (1, 1, hidden_size)
    max_err = float(jnp.max(jnp.abs(out - ref_out)))
    assert jnp.allclose(out, ref_out, atol=2e-3, rtol=2e-3), f"max err {max_err}"
    assert jnp.allclose(hid, ref_hid, atol=2e-3, rtol=2e-3)

    print("KERNEL_OK")
</pallas_src>

<mosaic_0001>
module attributes {stable_mosaic.version = 11 : i64} {
  func.func @gru_seq_kernel(%arg0: memref<8x1xi32, #tpu.memory_space<vmem>>, %arg1: memref<128x128xf32, #tpu.memory_space<vmem>>, %arg2: memref<1x128xf32, #tpu.memory_space<vmem>>, %arg3: memref<128x384xbf16, #tpu.memory_space<vmem>>, %arg4: memref<128x384xbf16, #tpu.memory_space<vmem>>, %arg5: memref<1x384xf32, #tpu.memory_space<vmem>>, %arg6: memref<1x384xf32, #tpu.memory_space<vmem>>, %arg7: memref<8x128xf32, #tpu.memory_space<vmem>>, %arg8: memref<8x384xf32, #tpu.memory_space<vmem>>) attributes {dimension_semantics = [], scalar_prefetch = 0 : i64, scratch_operands = 1 : i64, tpu.core_type = #tpu.core_type<tc>} {
    %c0 = arith.constant 0 : index
    %c0_0 = arith.constant 0 : index
    %0 = vector.load %arg0[%c0, %c0_0] : memref<8x1xi32, #tpu.memory_space<vmem>>, vector<8x1xi32>
    %1 = tpu.iota {dimensions = array<i32: 1>} : vector<8x128xi32>
    %2 = vector.broadcast %0 : vector<8x1xi32> to vector<8x128xi32>
    %3 = arith.cmpi eq, %1, %2 : vector<8x128xi32>
    %4 = arith.extui %3 : vector<8x128xi1> to vector<8x128xi32>
    %5 = arith.sitofp %4 : vector<8x128xi32> to vector<8x128xf32>
    %c0_1 = arith.constant 0 : index
    %c0_2 = arith.constant 0 : index
    %6 = vector.load %arg1[%c0_1, %c0_2] : memref<128x128xf32, #tpu.memory_space<vmem>>, vector<128x128xf32>
    %cst = arith.constant dense<0.000000e+00> : vector<8x128xf32>
    %7 = tpu.matmul %5, %6, %cst {dimension_numbers = #tpu.dot_dimension_numbers<[1], [0], [0], [1], [0, 0, 1, 1], [], []>} : vector<8x128xf32>, vector<128x128xf32>, vector<8x128xf32> -> vector<8x128xf32>
    %8 = arith.truncf %7 : vector<8x128xf32> to vector<8x128xbf16>
    %c0_3 = arith.constant 0 : index
    %c0_4 = arith.constant 0 : index
    %9 = vector.load %arg3[%c0_3, %c0_4] : memref<128x384xbf16, #tpu.memory_space<vmem>>, vector<128x384xbf16>
    %cst_5 = arith.constant dense<0.000000e+00> : vector<8x384xf32>
    %10 = tpu.matmul %8, %9, %cst_5 {dimension_numbers = #tpu.dot_dimension_numbers<[1], [0], [0], [1], [0, 0, 1, 1], [], []>} : vector<8x128xbf16>, vector<128x384xbf16>, vector<8x384xf32> -> vector<8x384xf32>
    %c0_6 = arith.constant 0 : index
    %c0_7 = arith.constant 0 : index
    %11 = vector.load %arg5[%c0_6, %c0_7] : memref<1x384xf32, #tpu.memory_space<vmem>>, vector<1x384xf32>
    %12 = vector.broadcast %11 : vector<1x384xf32> to vector<8x384xf32>
    %13 = arith.addf %10, %12 : vector<8x384xf32>
    %c0_8 = arith.constant 0 : index
    %c0_9 = arith.constant 0 : index
    %14 = vector.load %arg6[%c0_8, %c0_9] : memref<1x384xf32, #tpu.memory_space<vmem>>, vector<1x384xf32>
    %15 = vector.extract_strided_slice %13 {offsets = [0, 0], sizes = [8, 256], strides = [1, 1]} : vector<8x384xf32> to vector<8x256xf32>
    %16 = vector.extract_strided_slice %14 {offsets = [0, 0], sizes = [1, 256], strides = [1, 1]} : vector<1x384xf32> to vector<1x256xf32>
    %17 = vector.broadcast %16 : vector<1x256xf32> to vector<8x256xf32>
    %18 = arith.addf %15, %17 : vector<8x256xf32>
    %c0_10 = arith.constant 0 : index
    %c0_11 = arith.constant 0 : index
    %19 = vector.load %arg8[%c0_10, %c0_11] : memref<8x384xf32, #tpu.memory_space<vmem>>, vector<8x256xf32>
    tpu.vector_store %arg8[%c0_10, %c0_11], %18 {strides = array<i32>} : memref<8x384xf32, #tpu.memory_space<vmem>>, vector<8x256xf32>,
    %20 = vector.extract_strided_slice %13 {offsets = [0, 256], sizes = [8, 128], strides = [1, 1]} : vector<8x384xf32> to vector<8x128xf32>
    %c0_12 = arith.constant 0 : index
    %c256 = arith.constant 256 : index
    %21 = vector.load %arg8[%c0_12, %c256] : memref<8x384xf32, #tpu.memory_space<vmem>>, vector<8x128xf32>
    tpu.vector_store %arg8[%c0_12, %c256], %20 {strides = array<i32>} : memref<8x384xf32, #tpu.memory_space<vmem>>, vector<8x128xf32>,
    %22 = vector.extract_strided_slice %14 {offsets = [0, 256], sizes = [1, 128], strides = [1, 1]} : vector<1x384xf32> to vector<1x128xf32>
    %c0_13 = arith.constant 0 : index
    %c0_14 = arith.constant 0 : index
    %23 = vector.load %arg4[%c0_13, %c0_14] : memref<128x384xbf16, #tpu.memory_space<vmem>>, vector<128x384xbf16>
    %c0_15 = arith.constant 0 : index
    %c0_16 = arith.constant 0 : index
    %24 = vector.load %arg2[%c0_15, %c0_16] : memref<1x128xf32, #tpu.memory_space<vmem>>, vector<1x128xf32>
    %c0_i32 = arith.constant 0 : i32
    %25 = arith.index_cast %c0_i32 : i32 to index
    %c0_17 = arith.constant 0 : index
    %26 = vector.load %arg8[%25, %c0_17] : memref<8x384xf32, #tpu.memory_space<vmem>>, vector<1x384xf32>
    %27 = arith.truncf %24 : vector<1x128xf32> to vector<1x128xbf16>
    %cst_18 = arith.constant dense<0.000000e+00> : vector<1x384xf32>
    %28 = tpu.matmul %27, %23, %cst_18 {dimension_numbers = #tpu.dot_dimension_numbers<[1], [0], [0], [1], [0, 0, 1, 1], [], []>} : vector<1x128xbf16>, vector<128x384xbf16>, vector<1x384xf32> -> vector<1x384xf32>
    %29 = vector.extract_strided_slice %26 {offsets = [0, 0], sizes = [1, 128], strides = [1, 1]} : vector<1x384xf32> to vector<1x128xf32>
    %30 = vector.extract_strided_slice %28 {offsets = [0, 0], sizes = [1, 128], strides = [1, 1]} : vector<1x384xf32> to vector<1x128xf32>
    %31 = arith.addf %29, %30 : vector<1x128xf32>
    %32 = arith.negf %31 : vector<1x128xf32>
    %33 = math.exp %32 : vector<1x128xf32>
    %cst_19 = arith.constant 1.000000e+00 : f32
    %34 = vector.broadcast %cst_19 : f32 to vector<1x128xf32>
    %35 = arith.addf %34, %33 : vector<1x128xf32>
    %36 = arith.divf %34, %35 : vector<1x128xf32>
    %37 = vector.extract_strided_slice %26 {offsets = [0, 128], sizes = [1, 128], strides = [1, 1]} : vector<1x384xf32> to vector<1x128xf32>
    %38 = vector.extract_strided_slice %28 {offsets = [0, 128], sizes = [1, 128], strides = [1, 1]} : vector<1x384xf32> to vector<1x128xf32>
    %39 = arith.addf %37, %38 : vector<1x128xf32>
    %40 = arith.negf %39 : vector<1x128xf32>
    %41 = math.exp %40 : vector<1x128xf32>
    %cst_20 = arith.constant 1.000000e+00 : f32
    %42 = vector.broadcast %cst_20 : f32 to vector<1x128xf32>
    %43 = arith.addf %42, %41 : vector<1x128xf32>
    %44 = arith.divf %42, %43 : vector<1x128xf32>
    %45 = vector.extract_strided_slice %26 {offsets = [0, 256], sizes = [1, 128], strides = [1, 1]} : vector<1x384xf32> to vector<1x128xf32>
    %46 = vector.extract_strided_slice %28 {offsets = [0, 256], sizes = [1, 128], strides = [1, 1]} : vector<1x384xf32> to vector<1x128xf32>
    %47 = arith.addf %46, %22 : vector<1x128xf32>
    %48 = arith.mulf %36, %47 : vector<1x128xf32>
    %49 = arith.addf %45, %48 : vector<1x128xf32>
    %50 = math.tanh %49 : vector<1x128xf32>
    %cst_21 = arith.constant 1.000000e+00 : f32
    %51 = vector.broadcast %cst_21 : f32 to vector<1x128xf32>
    %52 = arith.subf %51, %44 : vector<1x128xf32>
    %53 = arith.mulf %52, %50 : vector<1x128xf32>
    %54 = arith.mulf %44, %24 : vector<1x128xf32>
    %55 = arith.addf %53, %54 : vector<1x128xf32>
    %56 = arith.index_cast %c0_i32 : i32 to index
    %c0_22 = arith.constant 0 : index
    %57 = vector.load %arg7[%56, %c0_22] : memref<8x128xf32, #tpu.memory_space<vmem>>, vector<1x128xf32>
    tpu.vector_store %arg7[%56, %c0_22], %55 {strides = array<i32>} : memref<8x128xf32, #tpu.memory_space<vmem>>, vector<1x128xf32>,
    %c1_i32 = arith.constant 1 : i32
    %58 = arith.index_cast %c1_i32 : i32 to index
    %c0_23 = arith.constant 0 : index
    %59 = vector.load %arg8[%58, %c0_23] : memref<8x384xf32, #tpu.memory_space<vmem>>, vector<1x384xf32>
    %60 = arith.truncf %55 : vector<1x128xf32> to vector<1x128xbf16>
    %cst_24 = arith.constant dense<0.000000e+00> : vector<1x384xf32>
    %61 = tpu.matmul %60, %23, %cst_24 {dimension_numbers = #tpu.dot_dimension_numbers<[1], [0], [0], [1], [0, 0, 1, 1], [], []>} : vector<1x128xbf16>, vector<128x384xbf16>, vector<1x384xf32> -> vector<1x384xf32>
    %62 = vector.extract_strided_slice %59 {offsets = [0, 0], sizes = [1, 128], strides = [1, 1]} : vector<1x384xf32> to vector<1x128xf32>
    %63 = vector.extract_strided_slice %61 {offsets = [0, 0], sizes = [1, 128], strides = [1, 1]} : vector<1x384xf32> to vector<1x128xf32>
    %64 = arith.addf %62, %63 : vector<1x128xf32>
    %65 = arith.negf %64 : vector<1x128xf32>
    %66 = math.exp %65 : vector<1x128xf32>
    %cst_25 = arith.constant 1.000000e+00 : f32
    %67 = vector.broadcast %cst_25 : f32 to vector<1x128xf32>
    %68 = arith.addf %67, %66 : vector<1x128xf32>
    %69 = arith.divf %67, %68 : vector<1x128xf32>
    %70 = vector.extract_strided_slice %59 {offsets = [0, 128], sizes = [1, 128], strides = [1, 1]} : vector<1x384xf32> to vector<1x128xf32>
    %71 = vector.extract_strided_slice %61 {offsets = [0, 128], sizes = [1, 128], strides = [1, 1]} : vector<1x384xf32> to vector<1x128xf32>
    %72 = arith.addf %70, %71 : vector<1x128xf32>
    %73 = arith.negf %72 : vector<1x128xf32>
    %74 = math.exp %73 : vector<1x128xf32>
    %cst_26 = arith.constant 1.000000e+00 : f32
    %75 = vector.broadcast %cst_26 : f32 to vector<1x128xf32>
    %76 = arith.addf %75, %74 : vector<1x128xf32>
    %77 = arith.divf %75, %76 : vector<1x128xf32>
    %78 = vector.extract_strided_slice %59 {offsets = [0, 256], sizes = [1, 128], strides = [1, 1]} : vector<1x384xf32> to vector<1x128xf32>
    %79 = vector.extract_strided_slice %61 {offsets = [0, 256], sizes = [1, 128], strides = [1, 1]} : vector<1x384xf32> to vector<1x128xf32>
    %80 = arith.addf %79, %22 : vector<1x128xf32>
    %81 = arith.mulf %69, %80 : vector<1x128xf32>
    %82 = arith.addf %78, %81 : vector<1x128xf32>
    %83 = math.tanh %82 : vector<1x128xf32>
    %cst_27 = arith.constant 1.000000e+00 : f32
    %84 = vector.broadcast %cst_27 : f32 to vector<1x128xf32>
    %85 = arith.subf %84, %77 : vector<1x128xf32>
    %86 = arith.mulf %85, %83 : vector<1x128xf32>
    %87 = arith.mulf %77, %55 : vector<1x128xf32>
    %88 = arith.addf %86, %87 : vector<1x128xf32>
    %89 = arith.index_cast %c1_i32 : i32 to index
    %c0_28 = arith.constant 0 : index
    %90 = vector.load %arg7[%89, %c0_28] : memref<8x128xf32, #tpu.memory_space<vmem>>, vector<1x128xf32>
    tpu.vector_store %arg7[%89, %c0_28], %88 {strides = array<i32>} : memref<8x128xf32, #tpu.memory_space<vmem>>, vector<1x128xf32>,
    %c2_i32 = arith.constant 2 : i32
    %91 = arith.index_cast %c2_i32 : i32 to index
    %c0_29 = arith.constant 0 : index
    %92 = vector.load %arg8[%91, %c0_29] : memref<8x384xf32, #tpu.memory_space<vmem>>, vector<1x384xf32>
    %93 = arith.truncf %88 : vector<1x128xf32> to vector<1x128xbf16>
    %cst_30 = arith.constant dense<0.000000e+00> : vector<1x384xf32>
    %94 = tpu.matmul %93, %23, %cst_30 {dimension_numbers = #tpu.dot_dimension_numbers<[1], [0], [0], [1], [0, 0, 1, 1], [], []>} : vector<1x128xbf16>, vector<128x384xbf16>, vector<1x384xf32> -> vector<1x384xf32>
    %95 = vector.extract_strided_slice %92 {offsets = [0, 0], sizes = [1, 128], strides = [1, 1]} : vector<1x384xf32> to vector<1x128xf32>
    %96 = vector.extract_strided_slice %94 {offsets = [0, 0], sizes = [1, 128], strides = [1, 1]} : vector<1x384xf32> to vector<1x128xf32>
    %97 = arith.addf %95, %96 : vector<1x128xf32>
    %98 = arith.negf %97 : vector<1x128xf32>
    %99 = math.exp %98 : vector<1x128xf32>
    %cst_31 = arith.constant 1.000000e+00 : f32
    %100 = vector.broadcast %cst_31 : f32 to vector<1x128xf32>
    %101 = arith.addf %100, %99 : vector<1x128xf32>
    %102 = arith.divf %100, %101 : vector<1x128xf32>
    %103 = vector.extract_strided_slice %92 {offsets = [0, 128], sizes = [1, 128], strides = [1, 1]} : vector<1x384xf32> to vector<1x128xf32>
    %104 = vector.extract_strided_slice %94 {offsets = [0, 128], sizes = [1, 128], strides = [1, 1]} : vector<1x384xf32> to vector<1x128xf32>
    %105 = arith.addf %103, %104 : vector<1x128xf32>
    %106 = arith.negf %105 : vector<1x128xf32>
    %107 = math.exp %106 : vector<1x128xf32>
    %cst_32 = arith.constant 1.000000e+00 : f32
    %108 = vector.broadcast %cst_32 : f32 to vector<1x128xf32>
    %109 = arith.addf %108, %107 : vector<1x128xf32>
    %110 = arith.divf %108, %109 : vector<1x128xf32>
    %111 = vector.extract_strided_slice %92 {offsets = [0, 256], sizes = [1, 128], strides = [1, 1]} : vector<1x384xf32> to vector<1x128xf32>
    %112 = vector.extract_strided_slice %94 {offsets = [0, 256], sizes = [1, 128], strides = [1, 1]} : vector<1x384xf32> to vector<1x128xf32>
    %113 = arith.addf %112, %22 : vector<1x128xf32>
    %114 = arith.mulf %102, %113 : vector<1x128xf32>
    %115 = arith.addf %111, %114 : vector<1x128xf32>
    %116 = math.tanh %115 : vector<1x128xf32>
    %cst_33 = arith.constant 1.000000e+00 : f32
    %117 = vector.broadcast %cst_33 : f32 to vector<1x128xf32>
    %118 = arith.subf %117, %110 : vector<1x128xf32>
    %119 = arith.mulf %118, %116 : vector<1x128xf32>
    %120 = arith.mulf %110, %88 : vector<1x128xf32>
    %121 = arith.addf %119, %120 : vector<1x128xf32>
    %122 = arith.index_cast %c2_i32 : i32 to index
    %c0_34 = arith.constant 0 : index
    %123 = vector.load %arg7[%122, %c0_34] : memref<8x128xf32, #tpu.memory_space<vmem>>, vector<1x128xf32>
    tpu.vector_store %arg7[%122, %c0_34], %121 {strides = array<i32>} : memref<8x128xf32, #tpu.memory_space<vmem>>, vector<1x128xf32>,
    %c3_i32 = arith.constant 3 : i32
    %124 = arith.index_cast %c3_i32 : i32 to index
    %c0_35 = arith.constant 0 : index
    %125 = vector.load %arg8[%124, %c0_35] : memref<8x384xf32, #tpu.memory_space<vmem>>, vector<1x384xf32>
    %126 = arith.truncf %121 : vector<1x128xf32> to vector<1x128xbf16>
    %cst_36 = arith.constant dense<0.000000e+00> : vector<1x384xf32>
    %127 = tpu.matmul %126, %23, %cst_36 {dimension_numbers = #tpu.dot_dimension_numbers<[1], [0], [0], [1], [0, 0, 1, 1], [], []>} : vector<1x128xbf16>, vector<128x384xbf16>, vector<1x384xf32> -> vector<1x384xf32>
    %128 = vector.extract_strided_slice %125 {offsets = [0, 0], sizes = [1, 128], strides = [1, 1]} : vector<1x384xf32> to vector<1x128xf32>
    %129 = vector.extract_strided_slice %127 {offsets = [0, 0], sizes = [1, 128], strides = [1, 1]} : vector<1x384xf32> to vector<1x128xf32>
    %130 = arith.addf %128, %129 : vector<1x128xf32>
    %131 = arith.negf %130 : vector<1x128xf32>
    %132 = math.exp %131 : vector<1x128xf32>
    %cst_37 = arith.constant 1.000000e+00 : f32
    %133 = vector.broadcast %cst_37 : f32 to vector<1x128xf32>
    %134 = arith.addf %133, %132 : vector<1x128xf32>
    %135 = arith.divf %133, %134 : vector<1x128xf32>
    %136 = vector.extract_strided_slice %125 {offsets = [0, 128], sizes = [1, 128], strides = [1, 1]} : vector<1x384xf32> to vector<1x128xf32>
    %137 = vector.extract_strided_slice %127 {offsets = [0, 128], sizes = [1, 128], strides = [1, 1]} : vector<1x384xf32> to vector<1x128xf32>
    %138 = arith.addf %136, %137 : vector<1x128xf32>
    %139 = arith.negf %138 : vector<1x128xf32>
    %140 = math.exp %139 : vector<1x128xf32>
    %cst_38 = arith.constant 1.000000e+00 : f32
    %141 = vector.broadcast %cst_38 : f32 to vector<1x128xf32>
    %142 = arith.addf %141, %140 : vector<1x128xf32>
    %143 = arith.divf %141, %142 : vector<1x128xf32>
    %144 = vector.extract_strided_slice %125 {offsets = [0, 256], sizes = [1, 128], strides = [1, 1]} : vector<1x384xf32> to vector<1x128xf32>
    %145 = vector.extract_strided_slice %127 {offsets = [0, 256], sizes = [1, 128], strides = [1, 1]} : vector<1x384xf32> to vector<1x128xf32>
    %146 = arith.addf %145, %22 : vector<1x128xf32>
    %147 = arith.mulf %135, %146 : vector<1x128xf32>
    %148 = arith.addf %144, %147 : vector<1x128xf32>
    %149 = math.tanh %148 : vector<1x128xf32>
    %cst_39 = arith.constant 1.000000e+00 : f32
    %150 = vector.broadcast %cst_39 : f32 to vector<1x128xf32>
    %151 = arith.subf %150, %143 : vector<1x128xf32>
    %152 = arith.mulf %151, %149 : vector<1x128xf32>
    %153 = arith.mulf %143, %121 : vector<1x128xf32>
    %154 = arith.addf %152, %153 : vector<1x128xf32>
    %155 = arith.index_cast %c3_i32 : i32 to index
    %c0_40 = arith.constant 0 : index
    %156 = vector.load %arg7[%155, %c0_40] : memref<8x128xf32, #tpu.memory_space<vmem>>, vector<1x128xf32>
    tpu.vector_store %arg7[%155, %c0_40], %154 {strides = array<i32>} : memref<8x128xf32, #tpu.memory_space<vmem>>, vector<1x128xf32>,
    %c4_i32 = arith.constant 4 : i32
    %157 = arith.index_cast %c4_i32 : i32 to index
    %c0_41 = arith.constant 0 : index
    %158 = vector.load %arg8[%157, %c0_41] : memref<8x384xf32, #tpu.memory_space<vmem>>, vector<1x384xf32>
    %159 = arith.truncf %154 : vector<1x128xf32> to vector<1x128xbf16>
    %cst_42 = arith.constant dense<0.000000e+00> : vector<1x384xf32>
    %160 = tpu.matmul %159, %23, %cst_42 {dimension_numbers = #tpu.dot_dimension_numbers<[1], [0], [0], [1], [0, 0, 1, 1], [], []>} : vector<1x128xbf16>, vector<128x384xbf16>, vector<1x384xf32> -> vector<1x384xf32>
    %161 = vector.extract_strided_slice %158 {offsets = [0, 0], sizes = [1, 128], strides = [1, 1]} : vector<1x384xf32> to vector<1x128xf32>
    %162 = vector.extract_strided_slice %160 {offsets = [0, 0], sizes = [1, 128], strides = [1, 1]} : vector<1x384xf32> to vector<1x128xf32>
    %163 = arith.addf %161, %162 : vector<1x128xf32>
    %164 = arith.negf %163 : vector<1x128xf32>
    %165 = math.exp %164 : vector<1x128xf32>
    %cst_43 = arith.constant 1.000000e+00 : f32
    %166 = vector.broadcast %cst_43 : f32 to vector<1x128xf32>
    %167 = arith.addf %166, %165 : vector<1x128xf32>
    %168 = arith.divf %166, %167 : vector<1x128xf32>
    %169 = vector.extract_strided_slice %158 {offsets = [0, 128], sizes = [1, 128], strides = [1, 1]} : vector<1x384xf32> to vector<1x128xf32>
    %170 = vector.extract_strided_slice %160 {offsets = [0, 128], sizes = [1, 128], strides = [1, 1]} : vector<1x384xf32> to vector<1x128xf32>
    %171 = arith.addf %169, %170 : vector<1x128xf32>
    %172 = arith.negf %171 : vector<1x128xf32>
    %173 = math.exp %172 : vector<1x128xf32>
    %cst_44 = arith.constant 1.000000e+00 : f32
    %174 = vector.broadcast %cst_44 : f32 to vector<1x128xf32>
    %175 = arith.addf %174, %173 : vector<1x128xf32>
    %176 = arith.divf %174, %175 : vector<1x128xf32>
    %177 = vector.extract_strided_slice %158 {offsets = [0, 256], sizes = [1, 128], strides = [1, 1]} : vector<1x384xf32> to vector<1x128xf32>
    %178 = vector.extract_strided_slice %160 {offsets = [0, 256], sizes = [1, 128], strides = [1, 1]} : vector<1x384xf32> to vector<1x128xf32>
    %179 = arith.addf %178, %22 : vector<1x128xf32>
    %180 = arith.mulf %168, %179 : vector<1x128xf32>
    %181 = arith.addf %177, %180 : vector<1x128xf32>
    %182 = math.tanh %181 : vector<1x128xf32>
    %cst_45 = arith.constant 1.000000e+00 : f32
    %183 = vector.broadcast %cst_45 : f32 to vector<1x128xf32>
    %184 = arith.subf %183, %176 : vector<1x128xf32>
    %185 = arith.mulf %184, %182 : vector<1x128xf32>
    %186 = arith.mulf %176, %154 : vector<1x128xf32>
    %187 = arith.addf %185, %186 : vector<1x128xf32>
    %188 = arith.index_cast %c4_i32 : i32 to index
    %c0_46 = arith.constant 0 : index
    %189 = vector.load %arg7[%188, %c0_46] : memref<8x128xf32, #tpu.memory_space<vmem>>, vector<1x128xf32>
    tpu.vector_store %arg7[%188, %c0_46], %187 {strides = array<i32>} : memref<8x128xf32, #tpu.memory_space<vmem>>, vector<1x128xf32>,
    %c5_i32 = arith.constant 5 : i32
    %190 = arith.index_cast %c5_i32 : i32 to index
    %c0_47 = arith.constant 0 : index
    %191 = vector.load %arg8[%190, %c0_47] : memref<8x384xf32, #tpu.memory_space<vmem>>, vector<1x384xf32>
    %192 = arith.truncf %187 : vector<1x128xf32> to vector<1x128xbf16>
    %cst_48 = arith.constant dense<0.000000e+00> : vector<1x384xf32>
    %193 = tpu.matmul %192, %23, %cst_48 {dimension_numbers = #tpu.dot_dimension_numbers<[1], [0], [0], [1], [0, 0, 1, 1], [], []>} : vector<1x128xbf16>, vector<128x384xbf16>, vector<1x384xf32> -> vector<1x384xf32>
    %194 = vector.extract_strided_slice %191 {offsets = [0, 0], sizes = [1, 128], strides = [1, 1]} : vector<1x384xf32> to vector<1x128xf32>
    %195 = vector.extract_strided_slice %193 {offsets = [0, 0], sizes = [1, 128], strides = [1, 1]} : vector<1x384xf32> to vector<1x128xf32>
    %196 = arith.addf %194, %195 : vector<1x128xf32>
    %197 = arith.negf %196 : vector<1x128xf32>
    %198 = math.exp %197 : vector<1x128xf32>
    %cst_49 = arith.constant 1.000000e+00 : f32
    %199 = vector.broadcast %cst_49 : f32 to vector<1x128xf32>
    %200 = arith.addf %199, %198 : vector<1x128xf32>
    %201 = arith.divf %199, %200 : vector<1x128xf32>
    %202 = vector.extract_strided_slice %191 {offsets = [0, 128], sizes = [1, 128], strides = [1, 1]} : vector<1x384xf32> to vector<1x128xf32>
    %203 = vector.extract_strided_slice %193 {offsets = [0, 128], sizes = [1, 128], strides = [1, 1]} : vector<1x384xf32> to vector<1x128xf32>
    %204 = arith.addf %202, %203 : vector<1x128xf32>
    %205 = arith.negf %204 : vector<1x128xf32>
    %206 = math.exp %205 : vector<1x128xf32>
    %cst_50 = arith.constant 1.000000e+00 : f32
    %207 = vector.broadcast %cst_50 : f32 to vector<1x128xf32>
    %208 = arith.addf %207, %206 : vector<1x128xf32>
    %209 = arith.divf %207, %208 : vector<1x128xf32>
    %210 = vector.extract_strided_slice %191 {offsets = [0, 256], sizes = [1, 128], strides = [1, 1]} : vector<1x384xf32> to vector<1x128xf32>
    %211 = vector.extract_strided_slice %193 {offsets = [0, 256], sizes = [1, 128], strides = [1, 1]} : vector<1x384xf32> to vector<1x128xf32>
    %212 = arith.addf %211, %22 : vector<1x128xf32>
    %213 = arith.mulf %201, %212 : vector<1x128xf32>
    %214 = arith.addf %210, %213 : vector<1x128xf32>
    %215 = math.tanh %214 : vector<1x128xf32>
    %cst_51 = arith.constant 1.000000e+00 : f32
    %216 = vector.broadcast %cst_51 : f32 to vector<1x128xf32>
    %217 = arith.subf %216, %209 : vector<1x128xf32>
    %218 = arith.mulf %217, %215 : vector<1x128xf32>
    %219 = arith.mulf %209, %187 : vector<1x128xf32>
    %220 = arith.addf %218, %219 : vector<1x128xf32>
    %221 = arith.index_cast %c5_i32 : i32 to index
    %c0_52 = arith.constant 0 : index
    %222 = vector.load %arg7[%221, %c0_52] : memref<8x128xf32, #tpu.memory_space<vmem>>, vector<1x128xf32>
    tpu.vector_store %arg7[%221, %c0_52], %220 {strides = array<i32>} : memref<8x128xf32, #tpu.memory_space<vmem>>, vector<1x128xf32>,
    %c6_i32 = arith.constant 6 : i32
    %223 = arith.index_cast %c6_i32 : i32 to index
    %c0_53 = arith.constant 0 : index
    %224 = vector.load %arg8[%223, %c0_53] : memref<8x384xf32, #tpu.memory_space<vmem>>, vector<1x384xf32>
    %225 = arith.truncf %220 : vector<1x128xf32> to vector<1x128xbf16>
    %cst_54 = arith.constant dense<0.000000e+00> : vector<1x384xf32>
    %226 = tpu.matmul %225, %23, %cst_54 {dimension_numbers = #tpu.dot_dimension_numbers<[1], [0], [0], [1], [0, 0, 1, 1], [], []>} : vector<1x128xbf16>, vector<128x384xbf16>, vector<1x384xf32> -> vector<1x384xf32>
    %227 = vector.extract_strided_slice %224 {offsets = [0, 0], sizes = [1, 128], strides = [1, 1]} : vector<1x384xf32> to vector<1x128xf32>
    %228 = vector.extract_strided_slice %226 {offsets = [0, 0], sizes = [1, 128], strides = [1, 1]} : vector<1x384xf32> to vector<1x128xf32>
    %229 = arith.addf %227, %228 : vector<1x128xf32>
    %230 = arith.negf %229 : vector<1x128xf32>
    %231 = math.exp %230 : vector<1x128xf32>
    %cst_55 = arith.constant 1.000000e+00 : f32
    %232 = vector.broadcast %cst_55 : f32 to vector<1x128xf32>
    %233 = arith.addf %232, %231 : vector<1x128xf32>
    %234 = arith.divf %232, %233 : vector<1x128xf32>
    %235 = vector.extract_strided_slice %224 {offsets = [0, 128], sizes = [1, 128], strides = [1, 1]} : vector<1x384xf32> to vector<1x128xf32>
    %236 = vector.extract_strided_slice %226 {offsets = [0, 128], sizes = [1, 128], strides = [1, 1]} : vector<1x384xf32> to vector<1x128xf32>
    %237 = arith.addf %235, %236 : vector<1x128xf32>
    %238 = arith.negf %237 : vector<1x128xf32>
    %239 = math.exp %238 : vector<1x128xf32>
    %cst_56 = arith.constant 1.000000e+00 : f32
    %240 = vector.broadcast %cst_56 : f32 to vector<1x128xf32>
    %241 = arith.addf %240, %239 : vector<1x128xf32>
    %242 = arith.divf %240, %241 : vector<1x128xf32>
    %243 = vector.extract_strided_slice %224 {offsets = [0, 256], sizes = [1, 128], strides = [1, 1]} : vector<1x384xf32> to vector<1x128xf32>
    %244 = vector.extract_strided_slice %226 {offsets = [0, 256], sizes = [1, 128], strides = [1, 1]} : vector<1x384xf32> to vector<1x128xf32>
    %245 = arith.addf %244, %22 : vector<1x128xf32>
    %246 = arith.mulf %234, %245 : vector<1x128xf32>
    %247 = arith.addf %243, %246 : vector<1x128xf32>
    %248 = math.tanh %247 : vector<1x128xf32>
    %cst_57 = arith.constant 1.000000e+00 : f32
    %249 = vector.broadcast %cst_57 : f32 to vector<1x128xf32>
    %250 = arith.subf %249, %242 : vector<1x128xf32>
    %251 = arith.mulf %250, %248 : vector<1x128xf32>
    %252 = arith.mulf %242, %220 : vector<1x128xf32>
    %253 = arith.addf %251, %252 : vector<1x128xf32>
    %254 = arith.index_cast %c6_i32 : i32 to index
    %c0_58 = arith.constant 0 : index
    %255 = vector.load %arg7[%254, %c0_58] : memref<8x128xf32, #tpu.memory_space<vmem>>, vector<1x128xf32>
    tpu.vector_store %arg7[%254, %c0_58], %253 {strides = array<i32>} : memref<8x128xf32, #tpu.memory_space<vmem>>, vector<1x128xf32>,
    %c7_i32 = arith.constant 7 : i32
    %256 = arith.index_cast %c7_i32 : i32 to index
    %c0_59 = arith.constant 0 : index
    %257 = vector.load %arg8[%256, %c0_59] : memref<8x384xf32, #tpu.memory_space<vmem>>, vector<1x384xf32>
    %258 = arith.truncf %253 : vector<1x128xf32> to vector<1x128xbf16>
    %cst_60 = arith.constant dense<0.000000e+00> : vector<1x384xf32>
    %259 = tpu.matmul %258, %23, %cst_60 {dimension_numbers = #tpu.dot_dimension_numbers<[1], [0], [0], [1], [0, 0, 1, 1], [], []>} : vector<1x128xbf16>, vector<128x384xbf16>, vector<1x384xf32> -> vector<1x384xf32>
    %260 = vector.extract_strided_slice %257 {offsets = [0, 0], sizes = [1, 128], strides = [1, 1]} : vector<1x384xf32> to vector<1x128xf32>
    %261 = vector.extract_strided_slice %259 {offsets = [0, 0], sizes = [1, 128], strides = [1, 1]} : vector<1x384xf32> to vector<1x128xf32>
    %262 = arith.addf %260, %261 : vector<1x128xf32>
    %263 = arith.negf %262 : vector<1x128xf32>
    %264 = math.exp %263 : vector<1x128xf32>
    %cst_61 = arith.constant 1.000000e+00 : f32
    %265 = vector.broadcast %cst_61 : f32 to vector<1x128xf32>
    %266 = arith.addf %265, %264 : vector<1x128xf32>
    %267 = arith.divf %265, %266 : vector<1x128xf32>
    %268 = vector.extract_strided_slice %257 {offsets = [0, 128], sizes = [1, 128], strides = [1, 1]} : vector<1x384xf32> to vector<1x128xf32>
    %269 = vector.extract_strided_slice %259 {offsets = [0, 128], sizes = [1, 128], strides = [1, 1]} : vector<1x384xf32> to vector<1x128xf32>
    %270 = arith.addf %268, %269 : vector<1x128xf32>
    %271 = arith.negf %270 : vector<1x128xf32>
    %272 = math.exp %271 : vector<1x128xf32>
    %cst_62 = arith.constant 1.000000e+00 : f32
    %273 = vector.broadcast %cst_62 : f32 to vector<1x128xf32>
    %274 = arith.addf %273, %272 : vector<1x128xf32>
    %275 = arith.divf %273, %274 : vector<1x128xf32>
    %276 = vector.extract_strided_slice %257 {offsets = [0, 256], sizes = [1, 128], strides = [1, 1]} : vector<1x384xf32> to vector<1x128xf32>
    %277 = vector.extract_strided_slice %259 {offsets = [0, 256], sizes = [1, 128], strides = [1, 1]} : vector<1x384xf32> to vector<1x128xf32>
    %278 = arith.addf %277, %22 : vector<1x128xf32>
    %279 = arith.mulf %267, %278 : vector<1x128xf32>
    %280 = arith.addf %276, %279 : vector<1x128xf32>
    %281 = math.tanh %280 : vector<1x128xf32>
    %cst_63 = arith.constant 1.000000e+00 : f32
    %282 = vector.broadcast %cst_63 : f32 to vector<1x128xf32>
    %283 = arith.subf %282, %275 : vector<1x128xf32>
    %284 = arith.mulf %283, %281 : vector<1x128xf32>
    %285 = arith.mulf %275, %253 : vector<1x128xf32>
    %286 = arith.addf %284, %285 : vector<1x128xf32>
    %287 = arith.index_cast %c7_i32 : i32 to index
    %c0_64 = arith.constant 0 : index
    %288 = vector.load %arg7[%287, %c0_64] : memref<8x128xf32, #tpu.memory_space<vmem>>, vector<1x128xf32>
    tpu.vector_store %arg7[%287, %c0_64], %286 {strides = array<i32>} : memref<8x128xf32, #tpu.memory_space<vmem>>, vector<1x128xf32>,
    %c8_i32 = arith.constant 8 : i32
    return
  }
}

</mosaic_0001>

<bundles_post_ra>
// kernel: tpu_custom_call.1
= control target key start
LH: loop header
LB: loop body
LE: loop exit
PB: predicated region body
PF: predicated region fallthrough
CT: control target
= control target key end

     0   :  { %12 = vsyncpa [#allocation4], 0  ;;  %s2694_s0 = inlined_call_operand.vmem [shape: s32[8,1], index: 0, kind: input, shape index: {}]   ;;  %s2695_s1 = inlined_call_operand.hbm [shape: f32[128,128], index: 1, kind: input, shape index: {}]   ;;  %s2696_s2 = inlined_call_operand.vmem [shape: f32[1,128], index: 2, kind: input, shape index: {}]   ;;  %s2697_s3 = inlined_call_operand.hbm [shape: bf16[128,384], index: 3, kind: input, shape index: {}]   ;;  %s2698_s4 = inlined_call_operand.hbm [shape: bf16[128,384], index: 4, kind: input, shape index: {}]   ;;  %s2699_s5 = inlined_call_operand.vmem [shape: f32[1,384], index: 5, kind: input, shape index: {}]   ;;  %s2700_s6 = inlined_call_operand.vmem [shape: f32[1,384], index: 6, kind: input, shape index: {}]   ;;  %s2701_s7 = inlined_call_operand.hbm [shape: f32[8,128], index: 7, kind: output, shape index: {}]  }
   0x1   :  { %13 = vsyncpa [#allocation7], 0 }
   0x2   :  { %14 = vsyncpa [#allocation5], 0  ;;  %s2185_s24 = smov [#allocation6]   ;;  %s2091_s28 = scalar_lea.hbm %s2697_s3, 3072 }
   0x3   :  { %s36_s25 = sshll.u32 %s2185_s24, 4  ;;  %p2092_p0 = scmp.ne.s32.totalorder %s2697_s3, %s2091_s28  ;;  %s37_s25 = int_to_ptr.vmem [resolvable:$true] %s36_s25 }
   0x4   :  { %p2095_p1 = scmp.lt.u32.totalorder %s2091_s28, %s2697_s3 }
   0x6   :  { %p2097_p2 = pnand %p2095_p1, %p2092_p0 }
   0x8   :  { %2100 = shalt.err (!%p2097_p2)
}
   0x9   :  { %s2101_s10 = scalar_lea.vmem %s37_s25, 3072  ;;  %p2106_p4 = scmp.lt.s32.totalorder %s37_s25, %s37_s25 }
   0xa   :  { %p2102_p3 = scmp.ne.s32.totalorder %s37_s25, %s2101_s10  ;;  %p2107_p5 = scmp.lt.s32.totalorder %s2101_s10, %s2101_s10 }
   0xc   :  { %p2108_p6 = por %p2107_p5, %p2106_p4 }
   0xe   :  { %p2109_p7 = pnand %p2108_p6, %p2102_p3 }
  0x10   :  { %2112 = shalt.err (!%p2109_p7)
}
  0x11   :  { %s2186_s11 = smov 192   ;;  %s2187_s12 = smov 12  }
  0x12   :  { %42 = dma.hbm_to_vmem [thread:$0]  %s2697_s3, 3072, %s37_s25, [#allocation7], %s2186_s11, %s2186_s11, %s2187_s12  }
  0x13   :  { %s2188_s15 = smov [#allocation3]   ;;  %s2113_s19 = scalar_lea.hbm %s2695_s1, 2048 }
  0x14   :  { %s22_s16 = sshll.u32 %s2188_s15, 4  ;;  %p2114_p8 = scmp.ne.s32.totalorder %s2695_s1, %s2113_s19  ;;  %s23_s16 = int_to_ptr.vmem [resolvable:$true] %s22_s16 }
  0x15   :  { %p2117_p9 = scmp.lt.u32.totalorder %s2113_s19, %s2695_s1 }
  0x17   :  { %p2119_p10 = pnand %p2117_p9, %p2114_p8 }
  0x19   :  { %2122 = shalt.err (!%p2119_p10)
}
  0x1a   :  { %s2123_s24 = scalar_lea.vmem %s23_s16, 2048  ;;  %p2128_p12 = scmp.lt.s32.totalorder %s23_s16, %s23_s16 }
  0x1b   :  { %p2124_p11 = scmp.ne.s32.totalorder %s23_s16, %s2123_s24  ;;  %p2129_p13 = scmp.lt.s32.totalorder %s2123_s24, %s2123_s24 }
  0x1d   :  { %p2130_p0 = por %p2129_p13, %p2128_p12 }
  0x1f   :  { %p2131_p1 = pnand %p2130_p0, %p2124_p11 }
  0x21   :  { %2134 = shalt.err (!%p2131_p1)
}
  0x22   :  { %s2189_s3 = smov 128   ;;  %s2190_s25 = smov 8  }
  0x23   :  { %28 = dma.hbm_to_vmem [thread:$0]  %s2695_s1, 2048, %s23_s16, [#allocation4], %s2189_s3, %s2189_s3, %s2190_s25  }
  0x24   :  { %s2191_s28 = smov [#allocation8]   ;;  %s2135_s9 = scalar_lea.hbm %s2698_s4, 3072 }
  0x25   :  { %s48_s29 = sshll.u32 %s2191_s28, 4  ;;  %p2136_p2 = scmp.ne.s32.totalorder %s2698_s4, %s2135_s9  ;;  %s49_s29 = int_to_ptr.vmem [resolvable:$true] %s48_s29 }
  0x26   :  { %p2139_p3 = scmp.lt.u32.totalorder %s2135_s9, %s2698_s4 }
  0x28   :  { %p2141_p4 = pnand %p2139_p3, %p2136_p2 }
  0x2a   :  { %2144 = shalt.err (!%p2141_p4)
}
  0x2b   :  { %s2145_s17 = scalar_lea.vmem %s49_s29, 3072  ;;  %p2150_p6 = scmp.lt.s32.totalorder %s49_s29, %s49_s29 }
  0x2c   :  { %p2146_p5 = scmp.ne.s32.totalorder %s49_s29, %s2145_s17  ;;  %p2151_p7 = scmp.lt.s32.totalorder %s2145_s17, %s2145_s17 }
  0x2e   :  { %p2152_p8 = por %p2151_p7, %p2150_p6 }
  0x30   :  { %p2153_p9 = pnand %p2152_p8, %p2146_p5 }
  0x32   :  { %2156 = shalt.err (!%p2153_p9)
}
  0x33   :  { %54 = dma.hbm_to_vmem [thread:$0]  %s2698_s4, 3072, %s49_s29, [#allocation7], %s2186_s11, %s2186_s11, %s2187_s12  }
  0x34   :  { %2179 = dma.done.wait [#allocation4], 2048  }
  0x35   :  { %2180 = vsyncadd [#allocation4], 4294965248 }
  0x36   :  { %2181 = dma.done.wait [#allocation7], 6144  }
  0x37   :  { %2182 = vsyncadd [#allocation7], 4294961152  ;;  %v2192_v0 = vmov 0   ;;  %v2193_v1 = vmov 0.0|0.0   ;;  %v69_v2 = vld [vmem:[%s2694_s0] sm:$0xff]  ;;  %v78_v3 = vld [vmem:[#allocation3] sm:$0xff]  ;;  %v70_v44 = vlaneseq }
  0x38   :  { %1933 = vset.pattern.permute.xlu0 %v2192_v0  ;;  %1896 = vmatprep.subr.bf16.mxu0 %v2193_v1  ;;  %v79_v4 = vld [vmem:[#allocation3 + $0x8] sm:$0xff]  ;;  %v80_v6 = vld [vmem:[#allocation3 + $0x10] sm:$0xff]  ;;  %v81_v7 = vld [vmem:[#allocation3 + $0x18] sm:$0xff]  ;;  %vm2194_vm0 = vmmov 0   ;;  %v2195_v8 = vmov 0.0   ;;  %v2196_v48 = vmov 1.0  }
  0x39   :  { %374 = vmatprep.mubr.bf16.mxu1 %v2192_v0  ;;  %73 = vperm.xlu0 %1933, %v69_v2   ;;  %v1897_v5 = vpack.c.bf16 %v79_v4, %v78_v3  ;;  %v1900_v9 = vpack.c.bf16 %v81_v7, %v80_v6  ;;  %v82_v10 = vld [vmem:[#allocation3 + $0x20] sm:$0xff]  ;;  %v83_v11 = vld [vmem:[#allocation3 + $0x28] sm:$0xff]  ;;  %v84_v12 = vld [vmem:[#allocation3 + $0x30] sm:$0xff]  ;;  %v71_v45 = vand.u32 127, %v70_v44 }
  0x3a   :  { %1713 = vmatprep.mubr.msk.f32.mxu0 %vm2194_vm0, %v2195_v8  ;;  %v1934_v13 = vld [vmem:[#allocation6 + $0x4] ss:$12 sps:$4 sm:$0xff]   ;;  %v1936_v14 = vld [vmem:[#allocation6] ss:$12 sps:$4 sm:$0xff]   ;;  %v1903_v15 = vpack.c.bf16 %v83_v11, %v82_v10  ;;  %v85_v16 = vld [vmem:[#allocation3 + $0x38] sm:$0xff] }
  0x3b   :  { %1898 = vmatpush3.bf16.msra.mxu0 %v1897_v5  ;;  %342 = vmatprep.subr.bf16.mxu1 %v1934_v13  ;;  %v1938_v17 = vld [vmem:[#allocation6 + $0x1c] ss:$12 sps:$4 sm:$0xff]   ;;  %v1940_v18 = vld [vmem:[#allocation6 + $0x18] ss:$12 sps:$4 sm:$0xff]   ;;  %v1906_v19 = vpack.c.bf16 %v85_v16, %v84_v12  ;;  %v1942_v21 = vld [vmem:[#allocation6 + $0x34] ss:$12 sps:$4 sm:$0xff]  }
  0x3c   :  { %1899 = vmatprep.subr.bf16.mxu0 %v2193_v1  ;;  %343 = vmatpush1.bf16.msra.mxu1 %v1936_v14  ;;  %v86_v20 = vld [vmem:[#allocation3 + $0x40] sm:$0xff]  ;;  %v87_v22 = vld [vmem:[#allocation3 + $0x48] sm:$0xff]  ;;  %v1944_v23 = vld [vmem:[#allocation6 + $0x30] ss:$12 sps:$4 sm:$0xff]  }
  0x3d   :  { %344 = vmatprep.subr.bf16.mxu1 %v1938_v17  ;;  %v88_v24 = vld [vmem:[#allocation3 + $0x50] sm:$0xff]  ;;  %v1946_v25 = vld [vmem:[#allocation6 + $0x4c] ss:$12 sps:$4 sm:$0xff]   ;;  %v1909_v26 = vpack.c.bf16 %v87_v22, %v86_v20  ;;  %v90_v30 = vld [vmem:[#allocation3 + $0x60] sm:$0xff] }
  0x3e   :  { %v89_v27 = vld [vmem:[#allocation3 + $0x58] sm:$0xff]  ;;  %v1948_v28 = vld [vmem:[#allocation6 + $0x48] ss:$12 sps:$4 sm:$0xff]   ;;  %v1950_v29 = vld [vmem:[#allocation6 + $0x64] ss:$12 sps:$4 sm:$0xff]  }
  0x3f   :  { %1901 = vmatpush3.bf16.msra.mxu0 %v1900_v9  ;;  %v1912_v31 = vpack.c.bf16 %v89_v27, %v88_v24  ;;  %v91_v32 = vld [vmem:[#allocation3 + $0x68] sm:$0xff]  ;;  %v92_v35 = vld [vmem:[#allocation3 + $0x70] sm:$0xff]  ;;  %v93_v37 = vld [vmem:[#allocation3 + $0x78] sm:$0xff] }
  0x40   :  { %1902 = vmatprep.subr.bf16.mxu0 %v2193_v1  ;;  %345 = vmatpush1.bf16.msra.mxu1 %v1940_v18  ;;  %v1952_v33 = vld [vmem:[#allocation6 + $0x60] ss:$12 sps:$4 sm:$0xff]   ;;  %v1954_v34 = vld [vmem:[#allocation6 + $0x7c] ss:$12 sps:$4 sm:$0xff]   ;;  %v1915_v36 = vpack.c.bf16 %v91_v32, %v90_v30  ;;  %v1956_v38 = vld [vmem:[#allocation6 + $0x78] ss:$12 sps:$4 sm:$0xff]   ;;  %v1918_v40 = vpack.c.bf16 %v93_v37, %v92_v35 }
  0x41   :  { %346 = vmatprep.subr.bf16.mxu1 %v1942_v21  ;;  %v1958_v39 = vld [vmem:[#allocation6 + $0x94] ss:$12 sps:$4 sm:$0xff]   ;;  %v1960_v41 = vld [vmem:[#allocation6 + $0x90] ss:$12 sps:$4 sm:$0xff]   ;;  %v1962_v42 = vld [vmem:[#allocation6 + $0xac] ss:$12 sps:$4 sm:$0xff]  }
  0x42   :  { %v1964_v43 = vld [vmem:[#allocation6 + $0xa8] ss:$12 sps:$4 sm:$0xff]   ;;  %v1941_v49 = vld [vmem:[#allocation6 + $0x20] ss:$12 sps:$4 sm:$0xff]   ;;  %v1945_v50 = vld [vmem:[#allocation6 + $0x38] ss:$12 sps:$4 sm:$0xff]  }
  0x43   :  { %1904 = vmatpush3.bf16.msra.mxu0 %v1903_v15  ;;  %v1937_v46 = vld [vmem:[#allocation6 + $0x8] ss:$12 sps:$4 sm:$0xff]   ;;  %v1949_v51 = vld [vmem:[#allocation6 + $0x50] ss:$12 sps:$4 sm:$0xff]   ;;  %v1957_v53 = vld [vmem:[#allocation6 + $0x80] ss:$12 sps:$4 sm:$0xff]  }
  0x44   :  { %1905 = vmatprep.subr.bf16.mxu0 %v2193_v1  ;;  %347 = vmatpush1.bf16.msra.mxu1 %v1944_v23  ;;  %v1953_v52 = vld [vmem:[#allocation6 + $0x68] ss:$12 sps:$4 sm:$0xff]   ;;  %v1961_v54 = vld [vmem:[#allocation6 + $0x98] ss:$12 sps:$4 sm:$0xff]   ;;  %v1965_v55 = vld [vmem:[#allocation6 + $0xb0] ss:$12 sps:$4 sm:$0xff]  }
  0x45   :  { %348 = vmatprep.subr.bf16.mxu1 %v1946_v25  ;;  %v2306_v56 = vld [vmem:[#allocation8 + $0x4] ss:$12 sps:$4 sm:$0xff]   ;;  %v2310_v58 = vld [vmem:[#allocation8] ss:$12 sps:$4 sm:$0xff]   ;;  %v2312_v59 = vld [vmem:[#allocation8 + $0x8] ss:$12 sps:$4 sm:$0xff]  }
  0x46   :  { %v2314_v62 = vld [vmem:[#allocation8 + $0x1c] ss:$12 sps:$4 sm:$0xff]   ;;  %v2317_v63 = vld [vmem:[#allocation8 + $0x18] ss:$12 sps:$4 sm:$0xff]   ;;  %v2323_v2 = vld [vmem:[#allocation8 + $0x34] ss:$12 sps:$4 sm:$0xff]  }
  0x47   :  { %1907 = vmatpush3.bf16.msra.mxu0 %v1906_v19  ;;  %v2330_v3 = vld [vmem:[#allocation8 + $0x30] ss:$12 sps:$4 sm:$0xff]   ;;  %v2333_v4 = vld [vmem:[#allocation8 + $0x38] ss:$12 sps:$4 sm:$0xff]   ;;  %v2340_v6 = vld [vmem:[#allocation8 + $0x48] ss:$12 sps:$4 sm:$0xff]  }
  0x48   :  { %1908 = vmatprep.subr.bf16.mxu0 %v2193_v1  ;;  %349 = vmatpush1.bf16.msra.mxu1 %v1948_v28  ;;  %v2336_v5 = vld [vmem:[#allocation8 + $0x4c] ss:$12 sps:$4 sm:$0xff]   ;;  %v2343_v7 = vld [vmem:[#allocation8 + $0x50] ss:$12 sps:$4 sm:$0xff]   ;;  %v2353_v11 = vld [vmem:[#allocation8 + $0x68] ss:$12 sps:$4 sm:$0xff]  }
  0x49   :  { %350 = vmatprep.subr.bf16.mxu1 %v1950_v29  ;;  %v2346_v9 = vld [vmem:[#allocation8 + $0x64] ss:$12 sps:$4 sm:$0xff]   ;;  %v2350_v10 = vld [vmem:[#allocation8 + $0x60] ss:$12 sps:$4 sm:$0xff]   ;;  %v2356_v12 = vld [vmem:[#allocation8 + $0x7c] ss:$12 sps:$4 sm:$0xff]  }
  0x4a   :  { %v2360_v13 = vld [vmem:[#allocation8 + $0x78] ss:$12 sps:$4 sm:$0xff]   ;;  %v2363_v14 = vld [vmem:[#allocation8 + $0x80] ss:$12 sps:$4 sm:$0xff]   ;;  %v2370_v16 = vld [vmem:[#allocation8 + $0x90] ss:$12 sps:$4 sm:$0xff]  }
  0x4b   :  { %1910 = vmatpush3.bf16.msra.mxu0 %v1909_v26  ;;  %v2366_v15 = vld [vmem:[#allocation8 + $0x94] ss:$12 sps:$4 sm:$0xff]   ;;  %v2373_v17 = vld [vmem:[#allocation8 + $0x98] ss:$12 sps:$4 sm:$0xff]   ;;  %v2385_v20 = vld [vmem:[%s2696_s2] sm:$0x1] }
  0x4c   :  { %1911 = vmatprep.subr.bf16.mxu0 %v2193_v1  ;;  %351 = vmatpush1.bf16.msra.mxu1 %v1952_v33  ;;  %v2376_v18 = vld [vmem:[#allocation8 + $0xac] ss:$12 sps:$4 sm:$0xff]   ;;  %v2380_v19 = vld [vmem:[#allocation8 + $0xa8] ss:$12 sps:$4 sm:$0xff]   ;;  %v2388_v21 = vld [vmem:[#allocation8 + $0xb0] ss:$12 sps:$4 sm:$0xff]   ;;  %v474_v22 = vpack.c.bf16 %v2385_v20, %v2385_v20 }
  0x4d   :  { %352 = vmatprep.subr.bf16.mxu1 %v1954_v34  ;;  %v200_v23 = vshrl.u32 %v70_v44, 7  ;;  %v197_v26 = vld [vmem:[%s2699_s5] sm:$0x7]  ;;  %s2197_s5 = smov [#allocation9]  }
  0x4e   :  { %v423_v28 = vld [vmem:[%s2700_s6] sm:$0x7]  ;;  %s1507_s6 = sshll.u32 %s2197_s5, 4  ;;  %s1508_s6 = int_to_ptr.vmem [resolvable:$true] %s1507_s6 }
  0x4f   :  { %1913 = vmatpush3.bf16.msra.mxu0 %v1912_v31  ;;  %v201_v24 = vsub.s32 0, %v200_v23  ;;  %v209_v25 = vsub.s32 2, %v200_v23  ;;  %v205_v27 = vsub.s32 1, %v200_v23  ;;  %s2157_s21 = scalar_lea.vmem %s1508_s6, 128  ;;  %p2162_p11 = scmp.lt.s32.totalorder %s1508_s6, %s1508_s6 }
  0x50   :  { %1914 = vmatprep.subr.bf16.mxu0 %v2193_v1  ;;  %353 = vmatpush1.bf16.msra.mxu1 %v1956_v38  ;;  %p2158_p10 = scmp.ne.s32.totalorder %s1508_s6, %s2157_s21  ;;  %p2163_p12 = scmp.lt.s32.totalorder %s2157_s21, %s2157_s21 }
  0x51   :  { %354 = vmatprep.subr.bf16.mxu1 %v1958_v39  ;;  %v202_v29 = vrot.slane %v197_v26, %v201_v24  ;;  %v210_v30 = vrot.slane %v197_v26, %v209_v25  ;;  %v206_v31 = vrot.slane %v197_v26, %v205_v27  ;;  %v428_v32 = vrot.slane %v423_v28, %v201_v24 }
  0x52   :  { %v432_v35 = vrot.slane %v423_v28, %v205_v27  ;;  %v2440_v27 = vrot.slane %v423_v28, %v209_v25  ;;  %p2164_p13 = por %p2163_p12, %p2162_p11 }
  0x53   :  { %1916 = vmatpush3.bf16.msra.mxu0 %v1915_v36 }
  0x54   :  { %1917 = vmatprep.subr.bf16.mxu0 %v2193_v1  ;;  %355 = vmatpush1.bf16.msra.mxu1 %v1960_v41  ;;  %v2320_v1 = vld [vmem:[#allocation8 + $0x20] ss:$12 sps:$4 sm:$0xff]   ;;  %p2165_p0 = pnand %p2164_p13, %p2158_p10 }
  0x55   :  { %356 = vmatprep.subr.bf16.mxu1 %v1962_v42 }
  0x57   :  { %1919 = vmatpush3.bf16.msra.mxu0 %v1918_v40 }
  0x58   :  { %1716 = vmatprep.subr.bf16.mxu0 %v2195_v8  ;;  %357 = vmatpush1.bf16.msra.mxu1 %v1964_v43 }
  0x59   :  { %603 = vmatprep.subr.bf16.mxu1 %v2306_v56 }
  0xb8   :  { %v74_v47 = vpop.permute.xlu0 %73 }
  0xb9   :  { %vm75_vm1 = vcmp.eq.s32.totalorder %v71_v45, %v74_v47 }
  0xba   :  { %1714 = vmatmul.mubr.msk.f32.vlgmr.msra.gmra.mrb[0].mxu0 %vm75_vm1, %v2196_v48 }
  0xbb   :  { %1717 = vmatpush3.bf16.msra.mxu0 %v1937_v46  ;;  %1732 = vmatprep.mubr.msk.bf16.mxu0 %vm2194_vm0, %v2195_v8 }
  0xbc   :  { %1718 = vmatprep.subr.bf16.mxu0 %v2195_v8 }
  0xbf   :  { %1719 = vmatpush3.bf16.msra.mxu0 %v1941_v49 }
  0xc0   :  { %1720 = vmatprep.subr.bf16.mxu0 %v2195_v8 }
  0xc3   :  { %1721 = vmatpush3.bf16.msra.mxu0 %v1945_v50 }
  0xc4   :  { %1722 = vmatprep.subr.bf16.mxu0 %v2195_v8 }
  0xc7   :  { %1723 = vmatpush3.bf16.msra.mxu0 %v1949_v51 }
  0xc8   :  { %1724 = vmatprep.subr.bf16.mxu0 %v2195_v8 }
  0xcb   :  { %1725 = vmatpush3.bf16.msra.mxu0 %v1953_v52 }
  0xcc   :  { %1726 = vmatprep.subr.bf16.mxu0 %v2195_v8 }
  0xcf   :  { %1727 = vmatpush3.bf16.msra.mxu0 %v1957_v53 }
  0xd0   :  { %1728 = vmatprep.subr.bf16.mxu0 %v2195_v8 }
  0xd3   :  { %1729 = vmatpush3.bf16.msra.mxu0 %v1961_v54 }
  0xd4   :  { %1730 = vmatprep.subr.bf16.mxu0 %v2195_v8 }
  0xd7   :  { %1731 = vmatpush3.bf16.msra.mxu0 %v1965_v55 }
  0xd8   :  { %1736 = vmatprep.subr.bf16.mxu0 %v2195_v8 }
 0x18d   :  { %v160_v57 = vpop.f32.mrb[0].mxu0 }
 0x18e   :  { %v164_v60 = vpack.c.bf16 %v160_v57, %v160_v57  ;;  %v1715_v61 = vpop.f32.mrb[1].mxu0 }
 0x190   :  { %375 = vmatmul.mubr.bf16.vlgmr.msra.gmra.mrb[0].mxu1 %v164_v60  ;;  %1733 = vmatmul.mubr.bf16.vlgmr.msra.gmra.mrb[4].mxu0 %v164_v60 }
 0x191   :  { %604 = vmatpush1.bf16.msra.mxu1 %v2310_v58  ;;  %1737 = vmatpush3.bf16.msra.mxu0 %v2312_v59 }
 0x192   :  { %605 = vmatprep.subr.bf16.mxu1 %v2314_v62  ;;  %1738 = vmatprep.subr.bf16.mxu0 %v2195_v8 }
 0x193   :  { %635 = vmatprep.mubr.bf16.mxu1 %v2192_v0  ;;  %1752 = vmatprep.mubr.msk.bf16.mxu0 %vm2194_vm0, %v2195_v8 }
 0x195   :  { %606 = vmatpush1.bf16.msra.mxu1 %v2317_v63  ;;  %1739 = vmatpush3.bf16.msra.mxu0 %v2320_v1 }
 0x196   :  { %607 = vmatprep.subr.bf16.mxu1 %v2323_v2  ;;  %1740 = vmatprep.subr.bf16.mxu0 %v2195_v8 }
 0x199   :  { %608 = vmatpush1.bf16.msra.mxu1 %v2330_v3  ;;  %1741 = vmatpush3.bf16.msra.mxu0 %v2333_v4 }
 0x19a   :  { %609 = vmatprep.subr.bf16.mxu1 %v2336_v5  ;;  %1742 = vmatprep.subr.bf16.mxu0 %v2195_v8 }
 0x19d   :  { %610 = vmatpush1.bf16.msra.mxu1 %v2340_v6  ;;  %1743 = vmatpush3.bf16.msra.mxu0 %v2343_v7 }
 0x19e   :  { %611 = vmatprep.subr.bf16.mxu1 %v2346_v9  ;;  %1744 = vmatprep.subr.bf16.mxu0 %v2195_v8 }
 0x1a1   :  { %612 = vmatpush1.bf16.msra.mxu1 %v2350_v10  ;;  %1745 = vmatpush3.bf16.msra.mxu0 %v2353_v11 }
 0x1a2   :  { %613 = vmatprep.subr.bf16.mxu1 %v2356_v12  ;;  %1746 = vmatprep.subr.bf16.mxu0 %v2195_v8 }
 0x1a5   :  { %614 = vmatpush1.bf16.msra.mxu1 %v2360_v13  ;;  %1747 = vmatpush3.bf16.msra.mxu0 %v2363_v14 }
 0x1a6   :  { %615 = vmatprep.subr.bf16.mxu1 %v2366_v15  ;;  %1748 = vmatprep.subr.bf16.mxu0 %v2195_v8 }
 0x1a9   :  { %616 = vmatpush1.bf16.msra.mxu1 %v2370_v16  ;;  %1749 = vmatpush3.bf16.msra.mxu0 %v2373_v17 }
 0x1aa   :  { %617 = vmatprep.subr.bf16.mxu1 %v2376_v18  ;;  %1750 = vmatprep.subr.bf16.mxu0 %v2195_v8 }
 0x1ad   :  { %618 = vmatpush1.bf16.msra.mxu1 %v2380_v19  ;;  %1751 = vmatpush3.bf16.msra.mxu0 %v2388_v21 }
 0x1ae   :  { %720 = vmatprep.subr.bf16.mxu1 %v2306_v56  ;;  %1756 = vmatprep.subr.bf16.mxu0 %v2195_v8 }
 0x1b0   :  { %636 = vmatmul.mubr.bf16.vlgmr.msra.gmra.mrb[4].mxu1 %v474_v22  ;;  %1753 = vmatmul.mubr.bf16.vlgmr.msra.gmra.mrb[8].mxu0 %v474_v22 }
 0x1b1   :  { %721 = vmatpush1.bf16.msra.mxu1 %v2310_v58  ;;  %1757 = vmatpush3.bf16.msra.mxu0 %v2312_v59 }
 0x1b2   :  { %722 = vmatprep.subr.bf16.mxu1 %v2314_v62  ;;  %1758 = vmatprep.subr.bf16.mxu0 %v2195_v8 }
 0x1b3   :  { %752 = vmatprep.mubr.bf16.mxu1 %v2192_v0  ;;  %1772 = vmatprep.mubr.msk.bf16.mxu0 %vm2194_vm0, %v2195_v8 }
 0x1b5   :  { %723 = vmatpush1.bf16.msra.mxu1 %v2317_v63  ;;  %1759 = vmatpush3.bf16.msra.mxu0 %v2320_v1 }
 0x1b6   :  { %724 = vmatprep.subr.bf16.mxu1 %v2323_v2  ;;  %1760 = vmatprep.subr.bf16.mxu0 %v2195_v8 }
 0x1b9   :  { %725 = vmatpush1.bf16.msra.mxu1 %v2330_v3  ;;  %1761 = vmatpush3.bf16.msra.mxu0 %v2333_v4 }
 0x1ba   :  { %726 = vmatprep.subr.bf16.mxu1 %v2336_v5  ;;  %1762 = vmatprep.subr.bf16.mxu0 %v2195_v8 }
 0x1bd   :  { %727 = vmatpush1.bf16.msra.mxu1 %v2340_v6  ;;  %1763 = vmatpush3.bf16.msra.mxu0 %v2343_v7 }
 0x1be   :  { %728 = vmatprep.subr.bf16.mxu1 %v2346_v9  ;;  %1764 = vmatprep.subr.bf16.mxu0 %v2195_v8 }
 0x1c1   :  { %729 = vmatpush1.bf16.msra.mxu1 %v2350_v10  ;;  %1765 = vmatpush3.bf16.msra.mxu0 %v2353_v11 }
 0x1c2   :  { %730 = vmatprep.subr.bf16.mxu1 %v2356_v12  ;;  %1766 = vmatprep.subr.bf16.mxu0 %v2195_v8 }
 0x1c5   :  { %731 = vmatpush1.bf16.msra.mxu1 %v2360_v13  ;;  %1767 = vmatpush3.bf16.msra.mxu0 %v2363_v14 }
 0x1c6   :  { %732 = vmatprep.subr.bf16.mxu1 %v2366_v15  ;;  %1768 = vmatprep.subr.bf16.mxu0 %v2195_v8 }
 0x1c9   :  { %733 = vmatpush1.bf16.msra.mxu1 %v2370_v16  ;;  %1769 = vmatpush3.bf16.msra.mxu0 %v2373_v17 }
 0x1ca   :  { %734 = vmatprep.subr.bf16.mxu1 %v2376_v18  ;;  %1770 = vmatprep.subr.bf16.mxu0 %v2195_v8 }
 0x1cd   :  { %735 = vmatpush1.bf16.msra.mxu1 %v2380_v19  ;;  %1771 = vmatpush3.bf16.msra.mxu0 %v2388_v21 }
 0x1ce   :  { %832 = vmatprep.subr.bf16.mxu1 %v2306_v56  ;;  %1776 = vmatprep.subr.bf16.mxu0 %v2195_v8 }
 0x263   :  { %v376_v33 = vpop.f32.mrb[0].mxu1  ;;  %v417_v34 = vpop.f32.mrb[4].mxu0 }
 0x264   :  { %v377_v36 = vadd.f32 %v376_v33, %v202_v29  ;;  %v418_v37 = vadd.f32 %v417_v34, %v210_v30  ;;  %v378_v38 = vpop.f32.mrb[1].mxu1  ;;  %v1734_v39 = vpop.f32.mrb[5].mxu0 }
 0x265   :  { %v379_v40 = vadd.f32 %v378_v38, %v206_v31  ;;  %v380_v41 = vpop.f32.mrb[2].mxu1  ;;  %v420_v42 = vpop.f32.mrb[6].mxu0 }
 0x266   :  { %v435_v43 = vadd.f32 %v428_v32, %v377_v36  ;;  %439 = vst [vmem:[#allocation2 + $0x10] sm:$0xff] %v418_v37  ;;  %v381_v44 = vpop.f32.mrb[3].mxu1  ;;  %v1735_v45 = vpop.f32.mrb[7].mxu0 }
 0x267   :  { %v436_v46 = vadd.f32 %v432_v35, %v379_v40 }
 0x268   :  { %437 = vst [vmem:[#allocation2] sm:$0xff] %v435_v43 }
 0x269   :  { %438 = vst [vmem:[#allocation2 + $0x8] sm:$0xff] %v436_v46 }
 0x270   :  { %v473_v47 = vld [vmem:[#allocation2] ss:$8 sm:$0x7] }
 0x271   :  { %v692_v53 = vrot.slane %v473_v47, 1  ;;  %v708_v33 = vrot.slane %v473_v47, 2 }
 0x283   :  { %v637_v48 = vpop.f32.mrb[4].mxu1  ;;  %v678_v49 = vpop.f32.mrb[8].mxu0 }
 0x284   :  { %v684_v50 = vadd.f32 %v637_v48, %v473_v47  ;;  %v639_v51 = vpop.f32.mrb[5].mxu1  ;;  %v1754_v52 = vpop.f32.mrb[9].mxu0  ;;  %v706_v31 = vadd.f32 %v2440_v27, %v678_v49 }
 0x285   :  { %v641_v54 = vpop.f32.mrb[6].mxu1  ;;  %v681_v55 = vpop.f32.mrb[10].mxu0  ;;  %v694_v22 = vadd.f32 %v692_v53, %v639_v51 }
 0x286   :  { %v1567_v57 = vmul.f32 -1.442695, %v684_v50  ;;  %v642_v60 = vpop.f32.mrb[7].mxu1  ;;  %v1755_v61 = vpop.f32.mrb[11].mxu0 }
 0x287   :  { %v1568_v23 = vmul.f32 -1.442695, %v694_v22 }
 0x288   :  { %1998 = vpow2.f32 %v1567_v57 }
 0x289   :  { %2000 = vpow2.f32 %v1568_v23 }
 0x292   :  { %v1999_v24 = vpop.eup %1998 }
 0x293   :  { %v688_v26 = vadd.f32 1.0, %v1999_v24  ;;  %v2001_v29 = vpop.eup %2000 }
 0x294   :  { %v698_v30 = vadd.f32 1.0, %v2001_v29 }
 0x295   :  { %2002 = vrcp.f32 %v688_v26 }
 0x296   :  { %2004 = vrcp.f32 %v698_v30 }
 0x29f   :  { %v2003_v32 = vpop.eup %2002 }
 0x2a0   :  { %v707_v34 = vmul.f32 %v2003_v32, %v706_v31  ;;  %v2005_v36 = vpop.eup %2004 }
 0x2a1   :  { %v712_v37 = vsub.f32 1.0, %v2005_v36  ;;  %v714_v40 = vmul.f32 %v2005_v36, %v2385_v20  ;;  %v718_v20 = vld [vmem:[#allocation2 + $0x1] ss:$8 sm:$0x7] }
 0x2a2   :  { %v710_v35 = vadd.f32 %v708_v33, %v707_v34  ;;  %v809_v46 = vrot.slane %v718_v20, 1  ;;  %v820_v23 = vrot.slane %v718_v20, 2  ;;  %v830_v36 = vld [vmem:[#allocation2 + $0x2] ss:$8 sm:$0x7] }
 0x2a4   :  { %2006 = vtanh.f32 %v710_v35 }
 0x2ae   :  { %v2007_v38 = vpop.eup %2006 }
 0x2af   :  { %v713_v39 = vmul.f32 %v2007_v38, %v712_v37 }
 0x2b1   :  { %v2444_v41 = vadd.f32 %v714_v40, %v713_v39 }
 0x2b3   :  { %716 = vst [vmem:[#allocation9] sm:$0x1] %v2444_v41  ;;  %v719_v25 = vpack.c.bf16 %v2444_v41, %v2444_v41 }
 0x2b5   :  { %753 = vmatmul.mubr.bf16.vlgmr.msra.gmra.mrb[8].mxu1 %v719_v25  ;;  %1773 = vmatmul.mubr.bf16.vlgmr.msra.gmra.mrb[12].mxu0 %v719_v25  ;;  %v921_v25 = vrot.slane %v830_v36, 1 }
 0x2b6   :  { %833 = vmatpush1.bf16.msra.mxu1 %v2310_v58  ;;  %1777 = vmatpush3.bf16.msra.mxu0 %v2312_v59 }
 0x2b7   :  { %834 = vmatprep.subr.bf16.mxu1 %v2314_v62  ;;  %1778 = vmatprep.subr.bf16.mxu0 %v2195_v8 }
 0x2b8   :  { %864 = vmatprep.mubr.bf16.mxu1 %v2192_v0  ;;  %1792 = vmatprep.mubr.msk.bf16.mxu0 %vm2194_vm0, %v2195_v8 }
 0x2ba   :  { %835 = vmatpush1.bf16.msra.mxu1 %v2317_v63  ;;  %1779 = vmatpush3.bf16.msra.mxu0 %v2320_v1 }
 0x2bb   :  { %836 = vmatprep.subr.bf16.mxu1 %v2323_v2  ;;  %1780 = vmatprep.subr.bf16.mxu0 %v2195_v8 }
 0x2be   :  { %837 = vmatpush1.bf16.msra.mxu1 %v2330_v3  ;;  %1781 = vmatpush3.bf16.msra.mxu0 %v2333_v4 }
 0x2bf   :  { %838 = vmatprep.subr.bf16.mxu1 %v2336_v5  ;;  %1782 = vmatprep.subr.bf16.mxu0 %v2195_v8 }
 0x2c2   :  { %839 = vmatpush1.bf16.msra.mxu1 %v2340_v6  ;;  %1783 = vmatpush3.bf16.msra.mxu0 %v2343_v7 }
 0x2c3   :  { %840 = vmatprep.subr.bf16.mxu1 %v2346_v9  ;;  %1784 = vmatprep.subr.bf16.mxu0 %v2195_v8 }
 0x2c6   :  { %841 = vmatpush1.bf16.msra.mxu1 %v2350_v10  ;;  %1785 = vmatpush3.bf16.msra.mxu0 %v2353_v11 }
 0x2c7   :  { %842 = vmatprep.subr.bf16.mxu1 %v2356_v12  ;;  %1786 = vmatprep.subr.bf16.mxu0 %v2195_v8 }
 0x2ca   :  { %843 = vmatpush1.bf16.msra.mxu1 %v2360_v13  ;;  %1787 = vmatpush3.bf16.msra.mxu0 %v2363_v14 }
 0x2cb   :  { %844 = vmatprep.subr.bf16.mxu1 %v2366_v15  ;;  %1788 = vmatprep.subr.bf16.mxu0 %v2195_v8 }
 0x2ce   :  { %845 = vmatpush1.bf16.msra.mxu1 %v2370_v16  ;;  %1789 = vmatpush3.bf16.msra.mxu0 %v2373_v17 }
 0x2cf   :  { %846 = vmatprep.subr.bf16.mxu1 %v2376_v18  ;;  %1790 = vmatprep.subr.bf16.mxu0 %v2195_v8 }
 0x2d2   :  { %847 = vmatpush1.bf16.msra.mxu1 %v2380_v19  ;;  %1791 = vmatpush3.bf16.msra.mxu0 %v2388_v21 }
 0x2d3   :  { %944 = vmatprep.subr.bf16.mxu1 %v2306_v56  ;;  %1796 = vmatprep.subr.bf16.mxu0 %v2195_v8 }
 0x388   :  { %v754_v28 = vpop.f32.mrb[8].mxu1  ;;  %v795_v42 = vpop.f32.mrb[12].mxu0 }
 0x389   :  { %v801_v43 = vadd.f32 %v754_v28, %v718_v20  ;;  %v756_v44 = vpop.f32.mrb[9].mxu1  ;;  %v1774_v45 = vpop.f32.mrb[13].mxu0  ;;  %v818_v61 = vadd.f32 %v795_v42, %v2440_v27 }
 0x38a   :  { %v758_v47 = vpop.f32.mrb[10].mxu1  ;;  %v798_v48 = vpop.f32.mrb[14].mxu0  ;;  %v811_v52 = vadd.f32 %v809_v46, %v756_v44 }
 0x38b   :  { %v1569_v49 = vmul.f32 -1.442695, %v801_v43  ;;  %v759_v50 = vpop.f32.mrb[11].mxu1  ;;  %v1775_v51 = vpop.f32.mrb[15].mxu0 }
 0x38c   :  { %v1570_v53 = vmul.f32 -1.442695, %v811_v52 }
 0x38d   :  { %2008 = vpow2.f32 %v1569_v49 }
 0x38e   :  { %2010 = vpow2.f32 %v1570_v53  ;;  %v932_v53 = vrot.slane %v830_v36, 2 }
 0x397   :  { %v2009_v54 = vpop.eup %2008 }
 0x398   :  { %v805_v55 = vadd.f32 1.0, %v2009_v54  ;;  %v2011_v57 = vpop.eup %2010 }
 0x399   :  { %v815_v60 = vadd.f32 1.0, %v2011_v57 }
 0x39a   :  { %2012 = vrcp.f32 %v805_v55 }
 0x39b   :  { %2014 = vrcp.f32 %v815_v60 }
 0x3a4   :  { %v2013_v22 = vpop.eup %2012 }
 0x3a5   :  { %v819_v24 = vmul.f32 %v2013_v22, %v818_v61  ;;  %v2015_v29 = vpop.eup %2014 }
 0x3a6   :  { %v824_v30 = vsub.f32 1.0, %v2015_v29  ;;  %v826_v33 = vmul.f32 %v2015_v29, %v2444_v41  ;;  %v942_v29 = vld [vmem:[#allocation2 + $0x3] ss:$8 sm:$0x7] }
 0x3a7   :  { %v822_v26 = vadd.f32 %v820_v23, %v819_v24 }
 0x3a9   :  { %2016 = vtanh.f32 %v822_v26 }
 0x3b3   :  { %v2017_v31 = vpop.eup %2016 }
 0x3b4   :  { %v825_v32 = vmul.f32 %v2017_v31, %v824_v30 }
 0x3b6   :  { %v2486_v34 = vadd.f32 %v826_v33, %v825_v32 }
 0x3b8   :  { %828 = vst [vmem:[#allocation9 + $0x1] sm:$0x1] %v2486_v34  ;;  %v831_v35 = vpack.c.bf16 %v2486_v34, %v2486_v34 }
 0x3ba   :  { %865 = vmatmul.mubr.bf16.vlgmr.msra.gmra.mrb[12].mxu1 %v831_v35  ;;  %1793 = vmatmul.mubr.bf16.vlgmr.msra.gmra.mrb[16].mxu0 %v831_v35  ;;  %v1033_v35 = vrot.slane %v942_v29, 1 }
 0x3bb   :  { %945 = vmatpush1.bf16.msra.mxu1 %v2310_v58  ;;  %1797 = vmatpush3.bf16.msra.mxu0 %v2312_v59 }
 0x3bc   :  { %946 = vmatprep.subr.bf16.mxu1 %v2314_v62  ;;  %1798 = vmatprep.subr.bf16.mxu0 %v2195_v8 }
 0x3bd   :  { %976 = vmatprep.mubr.bf16.mxu1 %v2192_v0  ;;  %1812 = vmatprep.mubr.msk.bf16.mxu0 %vm2194_vm0, %v2195_v8 }
 0x3bf   :  { %947 = vmatpush1.bf16.msra.mxu1 %v2317_v63  ;;  %1799 = vmatpush3.bf16.msra.mxu0 %v2320_v1 }
 0x3c0   :  { %948 = vmatprep.subr.bf16.mxu1 %v2323_v2  ;;  %1800 = vmatprep.subr.bf16.mxu0 %v2195_v8 }
 0x3c3   :  { %949 = vmatpush1.bf16.msra.mxu1 %v2330_v3  ;;  %1801 = vmatpush3.bf16.msra.mxu0 %v2333_v4 }
 0x3c4   :  { %950 = vmatprep.subr.bf16.mxu1 %v2336_v5  ;;  %1802 = vmatprep.subr.bf16.mxu0 %v2195_v8 }
 0x3c7   :  { %951 = vmatpush1.bf16.msra.mxu1 %v2340_v6  ;;  %1803 = vmatpush3.bf16.msra.mxu0 %v2343_v7 }
 0x3c8   :  { %952 = vmatprep.subr.bf16.mxu1 %v2346_v9  ;;  %1804 = vmatprep.subr.bf16.mxu0 %v2195_v8 }
 0x3cb   :  { %953 = vmatpush1.bf16.msra.mxu1 %v2350_v10  ;;  %1805 = vmatpush3.bf16.msra.mxu0 %v2353_v11 }
 0x3cc   :  { %954 = vmatprep.subr.bf16.mxu1 %v2356_v12  ;;  %1806 = vmatprep.subr.bf16.mxu0 %v2195_v8 }
 0x3cf   :  { %955 = vmatpush1.bf16.msra.mxu1 %v2360_v13  ;;  %1807 = vmatpush3.bf16.msra.mxu0 %v2363_v14 }
 0x3d0   :  { %956 = vmatprep.subr.bf16.mxu1 %v2366_v15  ;;  %1808 = vmatprep.subr.bf16.mxu0 %v2195_v8 }
 0x3d3   :  { %957 = vmatpush1.bf16.msra.mxu1 %v2370_v16  ;;  %1809 = vmatpush3.bf16.msra.mxu0 %v2373_v17 }
 0x3d4   :  { %958 = vmatprep.subr.bf16.mxu1 %v2376_v18  ;;  %1810 = vmatprep.subr.bf16.mxu0 %v2195_v8 }
 0x3d7   :  { %959 = vmatpush1.bf16.msra.mxu1 %v2380_v19  ;;  %1811 = vmatpush3.bf16.msra.mxu0 %v2388_v21 }
 0x3d8   :  { %1056 = vmatprep.subr.bf16.mxu1 %v2306_v56  ;;  %1816 = vmatprep.subr.bf16.mxu0 %v2195_v8 }
 0x48d   :  { %v866_v37 = vpop.f32.mrb[12].mxu1  ;;  %v907_v38 = vpop.f32.mrb[16].mxu0 }
 0x48e   :  { %v913_v39 = vadd.f32 %v866_v37, %v830_v36  ;;  %v868_v40 = vpop.f32.mrb[13].mxu1  ;;  %v1794_v41 = vpop.f32.mrb[17].mxu0  ;;  %v930_v51 = vadd.f32 %v907_v38, %v2440_v27 }
 0x48f   :  { %v870_v20 = vpop.f32.mrb[14].mxu1  ;;  %v910_v28 = vpop.f32.mrb[18].mxu0  ;;  %v923_v45 = vadd.f32 %v921_v25, %v868_v40 }
 0x490   :  { %v1571_v42 = vmul.f32 -1.442695, %v913_v39  ;;  %v871_v43 = vpop.f32.mrb[15].mxu1  ;;  %v1795_v44 = vpop.f32.mrb[19].mxu0 }
 0x491   :  { %v1572_v46 = vmul.f32 -1.442695, %v923_v45 }
 0x492   :  { %2018 = vpow2.f32 %v1571_v42 }
 0x493   :  { %2020 = vpow2.f32 %v1572_v46  ;;  %v1044_v46 = vrot.slane %v942_v29, 2 }
 0x49c   :  { %v2019_v47 = vpop.eup %2018 }
 0x49d   :  { %v917_v48 = vadd.f32 1.0, %v2019_v47  ;;  %v2021_v49 = vpop.eup %2020 }
 0x49e   :  { %v927_v50 = vadd.f32 1.0, %v2021_v49 }
 0x49f   :  { %2022 = vrcp.f32 %v917_v48 }
 0x4a0   :  { %2024 = vrcp.f32 %v927_v50 }
 0x4a9   :  { %v2023_v52 = vpop.eup %2022 }
 0x4aa   :  { %v931_v54 = vmul.f32 %v2023_v52, %v930_v51  ;;  %v2025_v57 = vpop.eup %2024 }
 0x4ab   :  { %v936_v60 = vsub.f32 1.0, %v2025_v57  ;;  %v938_v23 = vmul.f32 %v2025_v57, %v2486_v34  ;;  %v1054_v57 = vld [vmem:[#allocation2 + $0x4] ss:$8 sm:$0x7] }
 0x4ac   :  { %v934_v55 = vadd.f32 %v932_v53, %v931_v54 }
 0x4ae   :  { %2026 = vtanh.f32 %v934_v55 }
 0x4b8   :  { %v2027_v61 = vpop.eup %2026 }
 0x4b9   :  { %v937_v22 = vmul.f32 %v2027_v61, %v936_v60 }
 0x4bb   :  { %v2528_v24 = vadd.f32 %v938_v23, %v937_v22 }
 0x4bd   :  { %940 = vst [vmem:[#allocation9 + $0x2] sm:$0x1] %v2528_v24  ;;  %v943_v26 = vpack.c.bf16 %v2528_v24, %v2528_v24 }
 0x4bf   :  { %977 = vmatmul.mubr.bf16.vlgmr.msra.gmra.mrb[16].mxu1 %v943_v26  ;;  %1813 = vmatmul.mubr.bf16.vlgmr.msra.gmra.mrb[20].mxu0 %v943_v26  ;;  %v1145_v26 = vrot.slane %v1054_v57, 1 }
 0x4c0   :  { %1057 = vmatpush1.bf16.msra.mxu1 %v2310_v58  ;;  %1817 = vmatpush3.bf16.msra.mxu0 %v2312_v59 }
 0x4c1   :  { %1058 = vmatprep.subr.bf16.mxu1 %v2314_v62  ;;  %1818 = vmatprep.subr.bf16.mxu0 %v2195_v8 }
 0x4c2   :  { %1088 = vmatprep.mubr.bf16.mxu1 %v2192_v0  ;;  %1832 = vmatprep.mubr.msk.bf16.mxu0 %vm2194_vm0, %v2195_v8 }
 0x4c4   :  { %1059 = vmatpush1.bf16.msra.mxu1 %v2317_v63  ;;  %1819 = vmatpush3.bf16.msra.mxu0 %v2320_v1 }
 0x4c5   :  { %1060 = vmatprep.subr.bf16.mxu1 %v2323_v2  ;;  %1820 = vmatprep.subr.bf16.mxu0 %v2195_v8 }
 0x4c8   :  { %1061 = vmatpush1.bf16.msra.mxu1 %v2330_v3  ;;  %1821 = vmatpush3.bf16.msra.mxu0 %v2333_v4 }
 0x4c9   :  { %1062 = vmatprep.subr.bf16.mxu1 %v2336_v5  ;;  %1822 = vmatprep.subr.bf16.mxu0 %v2195_v8 }
 0x4cc   :  { %1063 = vmatpush1.bf16.msra.mxu1 %v2340_v6  ;;  %1823 = vmatpush3.bf16.msra.mxu0 %v2343_v7 }
 0x4cd   :  { %1064 = vmatprep.subr.bf16.mxu1 %v2346_v9  ;;  %1824 = vmatprep.subr.bf16.mxu0 %v2195_v8 }
 0x4d0   :  { %1065 = vmatpush1.bf16.msra.mxu1 %v2350_v10  ;;  %1825 = vmatpush3.bf16.msra.mxu0 %v2353_v11 }
 0x4d1   :  { %1066 = vmatprep.subr.bf16.mxu1 %v2356_v12  ;;  %1826 = vmatprep.subr.bf16.mxu0 %v2195_v8 }
 0x4d4   :  { %1067 = vmatpush1.bf16.msra.mxu1 %v2360_v13  ;;  %1827 = vmatpush3.bf16.msra.mxu0 %v2363_v14 }
 0x4d5   :  { %1068 = vmatprep.subr.bf16.mxu1 %v2366_v15  ;;  %1828 = vmatprep.subr.bf16.mxu0 %v2195_v8 }
 0x4d8   :  { %1069 = vmatpush1.bf16.msra.mxu1 %v2370_v16  ;;  %1829 = vmatpush3.bf16.msra.mxu0 %v2373_v17 }
 0x4d9   :  { %1070 = vmatprep.subr.bf16.mxu1 %v2376_v18  ;;  %1830 = vmatprep.subr.bf16.mxu0 %v2195_v8 }
 0x4dc   :  { %1071 = vmatpush1.bf16.msra.mxu1 %v2380_v19  ;;  %1831 = vmatpush3.bf16.msra.mxu0 %v2388_v21 }
 0x4dd   :  { %1168 = vmatprep.subr.bf16.mxu1 %v2306_v56  ;;  %1836 = vmatprep.subr.bf16.mxu0 %v2195_v8 }
 0x592   :  { %v978_v30 = vpop.f32.mrb[16].mxu1  ;;  %v1019_v31 = vpop.f32.mrb[20].mxu0 }
 0x593   :  { %v1025_v32 = vadd.f32 %v978_v30, %v942_v29  ;;  %v980_v33 = vpop.f32.mrb[17].mxu1  ;;  %v1814_v34 = vpop.f32.mrb[21].mxu0  ;;  %v1042_v44 = vadd.f32 %v1019_v31, %v2440_v27 }
 0x594   :  { %v982_v36 = vpop.f32.mrb[18].mxu1  ;;  %v1022_v37 = vpop.f32.mrb[22].mxu0  ;;  %v1035_v41 = vadd.f32 %v1033_v35, %v980_v33 }
 0x595   :  { %v1573_v38 = vmul.f32 -1.442695, %v1025_v32  ;;  %v983_v39 = vpop.f32.mrb[19].mxu1  ;;  %v1815_v40 = vpop.f32.mrb[23].mxu0 }
 0x596   :  { %v1574_v25 = vmul.f32 -1.442695, %v1035_v41 }
 0x597   :  { %2028 = vpow2.f32 %v1573_v38 }
 0x598   :  { %2030 = vpow2.f32 %v1574_v25  ;;  %v1156_v25 = vrot.slane %v1054_v57, 2 }
 0x5a1   :  { %v2029_v20 = vpop.eup %2028 }
 0x5a2   :  { %v1029_v28 = vadd.f32 1.0, %v2029_v20  ;;  %v2031_v42 = vpop.eup %2030 }
 0x5a3   :  { %v1039_v43 = vadd.f32 1.0, %v2031_v42 }
 0x5a4   :  { %2032 = vrcp.f32 %v1029_v28 }
 0x5a5   :  { %2034 = vrcp.f32 %v1039_v43 }
 0x5ae   :  { %v2033_v45 = vpop.eup %2032 }
 0x5af   :  { %v1043_v47 = vmul.f32 %v2033_v45, %v1042_v44  ;;  %v2035_v49 = vpop.eup %2034 }
 0x5b0   :  { %v1048_v50 = vsub.f32 1.0, %v2035_v49  ;;  %v1050_v53 = vmul.f32 %v2035_v49, %v2528_v24 }
 0x5b1   :  { %v1046_v48 = vadd.f32 %v1044_v46, %v1043_v47 }
 0x5b3   :  { %2036 = vtanh.f32 %v1046_v48 }
 0x5bd   :  { %v2037_v51 = vpop.eup %2036 }
 0x5be   :  { %v1049_v52 = vmul.f32 %v2037_v51, %v1048_v50 }
 0x5c0   :  { %v2570_v54 = vadd.f32 %v1050_v53, %v1049_v52 }
 0x5c2   :  { %1052 = vst [vmem:[#allocation9 + $0x3] sm:$0x1] %v2570_v54  ;;  %v1055_v55 = vpack.c.bf16 %v2570_v54, %v2570_v54 }
 0x5c4   :  { %1089 = vmatmul.mubr.bf16.vlgmr.msra.gmra.mrb[20].mxu1 %v1055_v55  ;;  %1833 = vmatmul.mubr.bf16.vlgmr.msra.gmra.mrb[24].mxu0 %v1055_v55 }
 0x5c5   :  { %1169 = vmatpush1.bf16.msra.mxu1 %v2310_v58  ;;  %1837 = vmatpush3.bf16.msra.mxu0 %v2312_v59 }
 0x5c6   :  { %1170 = vmatprep.subr.bf16.mxu1 %v2314_v62  ;;  %1838 = vmatprep.subr.bf16.mxu0 %v2195_v8 }
 0x5c7   :  { %1200 = vmatprep.mubr.bf16.mxu1 %v2192_v0  ;;  %1852 = vmatprep.mubr.msk.bf16.mxu0 %vm2194_vm0, %v2195_v8 }
 0x5c9   :  { %1171 = vmatpush1.bf16.msra.mxu1 %v2317_v63  ;;  %1839 = vmatpush3.bf16.msra.mxu0 %v2320_v1 }
 0x5ca   :  { %1172 = vmatprep.subr.bf16.mxu1 %v2323_v2  ;;  %1840 = vmatprep.subr.bf16.mxu0 %v2195_v8 }
 0x5cd   :  { %1173 = vmatpush1.bf16.msra.mxu1 %v2330_v3  ;;  %1841 = vmatpush3.bf16.msra.mxu0 %v2333_v4 }
 0x5ce   :  { %1174 = vmatprep.subr.bf16.mxu1 %v2336_v5  ;;  %1842 = vmatprep.subr.bf16.mxu0 %v2195_v8 }
 0x5d1   :  { %1175 = vmatpush1.bf16.msra.mxu1 %v2340_v6  ;;  %1843 = vmatpush3.bf16.msra.mxu0 %v2343_v7 }
 0x5d2   :  { %1176 = vmatprep.subr.bf16.mxu1 %v2346_v9  ;;  %1844 = vmatprep.subr.bf16.mxu0 %v2195_v8 }
 0x5d5   :  { %1177 = vmatpush1.bf16.msra.mxu1 %v2350_v10  ;;  %1845 = vmatpush3.bf16.msra.mxu0 %v2353_v11 }
 0x5d6   :  { %1178 = vmatprep.subr.bf16.mxu1 %v2356_v12  ;;  %1846 = vmatprep.subr.bf16.mxu0 %v2195_v8 }
 0x5d9   :  { %1179 = vmatpush1.bf16.msra.mxu1 %v2360_v13  ;;  %1847 = vmatpush3.bf16.msra.mxu0 %v2363_v14 }
 0x5da   :  { %1180 = vmatprep.subr.bf16.mxu1 %v2366_v15  ;;  %1848 = vmatprep.subr.bf16.mxu0 %v2195_v8 }
 0x5dd   :  { %1181 = vmatpush1.bf16.msra.mxu1 %v2370_v16  ;;  %1849 = vmatpush3.bf16.msra.mxu0 %v2373_v17 }
 0x5de   :  { %1182 = vmatprep.subr.bf16.mxu1 %v2376_v18  ;;  %1850 = vmatprep.subr.bf16.mxu0 %v2195_v8 }
 0x5e1   :  { %1183 = vmatpush1.bf16.msra.mxu1 %v2380_v19  ;;  %1851 = vmatpush3.bf16.msra.mxu0 %v2388_v21 }
 0x5e2   :  { %1280 = vmatprep.subr.bf16.mxu1 %v2306_v56  ;;  %1856 = vmatprep.subr.bf16.mxu0 %v2195_v8 }
 0x697   :  { %v1090_v60 = vpop.f32.mrb[20].mxu1  ;;  %v1131_v61 = vpop.f32.mrb[24].mxu0 }
 0x698   :  { %v1137_v22 = vadd.f32 %v1090_v60, %v1054_v57  ;;  %v1092_v23 = vpop.f32.mrb[21].mxu1  ;;  %v1834_v24 = vpop.f32.mrb[25].mxu0  ;;  %v1154_v40 = vadd.f32 %v1131_v61, %v2440_v27 }
 0x699   :  { %v1094_v29 = vpop.f32.mrb[22].mxu1  ;;  %v1134_v30 = vpop.f32.mrb[26].mxu0  ;;  %v1147_v34 = vadd.f32 %v1145_v26, %v1092_v23 }
 0x69a   :  { %v1575_v31 = vmul.f32 -1.442695, %v1137_v22  ;;  %v1095_v32 = vpop.f32.mrb[23].mxu1  ;;  %v1835_v33 = vpop.f32.mrb[27].mxu0 }
 0x69b   :  { %v1576_v35 = vmul.f32 -1.442695, %v1147_v34  ;;  %v2079_v32 = vld [vmem:[#allocation8 + $0x8] ss:$12 sps:$4 sm:$0xff]   ;;  %v2081_v34 = vld [vmem:[#allocation8 + $0x18] ss:$12 sps:$4 sm:$0xff]  }
 0x69c   :  { %2038 = vpow2.f32 %v1575_v31  ;;  %v2078_v31 = vld [vmem:[#allocation8] ss:$12 sps:$4 sm:$0xff]   ;;  %v2080_v33 = vld [vmem:[#allocation8 + $0x1c] ss:$12 sps:$4 sm:$0xff]  }
 0x69d   :  { %2040 = vpow2.f32 %v1576_v35  ;;  %v2082_v35 = vld [vmem:[#allocation8 + $0x20] ss:$12 sps:$4 sm:$0xff]  }
 0x6a6   :  { %v2039_v36 = vpop.eup %2038 }
 0x6a7   :  { %v1141_v37 = vadd.f32 1.0, %v2039_v36  ;;  %v2041_v38 = vpop.eup %2040  ;;  %v2083_v36 = vld [vmem:[#allocation8 + $0x34] ss:$12 sps:$4 sm:$0xff]  }
 0x6a8   :  { %v1151_v39 = vadd.f32 1.0, %v2041_v38  ;;  %v2085_v38 = vld [vmem:[#allocation8 + $0x38] ss:$12 sps:$4 sm:$0xff]  }
 0x6a9   :  { %2042 = vrcp.f32 %v1141_v37  ;;  %v2084_v37 = vld [vmem:[#allocation8 + $0x30] ss:$12 sps:$4 sm:$0xff]  }
 0x6aa   :  { %2044 = vrcp.f32 %v1151_v39  ;;  %v2086_v39 = vld [vmem:[#allocation8 + $0x4c] ss:$12 sps:$4 sm:$0xff]  }
 0x6b3   :  { %v2043_v41 = vpop.eup %2042 }
 0x6b4   :  { %v1155_v20 = vmul.f32 %v2043_v41, %v1154_v40  ;;  %v2045_v42 = vpop.eup %2044  ;;  %v2088_v40 = vld [vmem:[#allocation8 + $0x50] ss:$12 sps:$4 sm:$0xff]  }
 0x6b5   :  { %v1160_v43 = vsub.f32 1.0, %v2045_v42  ;;  %v1162_v46 = vmul.f32 %v2045_v42, %v2570_v54  ;;  %v2089_v41 = vld [vmem:[#allocation8 + $0x64] ss:$12 sps:$4 sm:$0xff]  }
 0x6b6   :  { %v1158_v28 = vadd.f32 %v1156_v25, %v1155_v20  ;;  %v2090_v25 = vld [vmem:[#allocation8 + $0x60] ss:$12 sps:$4 sm:$0xff]  }
 0x6b8   :  { %2046 = vtanh.f32 %v1158_v28 }
 0x6c2   :  { %v2047_v44 = vpop.eup %2046 }
 0x6c3   :  { %v1161_v45 = vmul.f32 %v2047_v44, %v1160_v43 }
 0x6c5   :  { %v2612_v47 = vadd.f32 %v1162_v46, %v1161_v45 }
 0x6c7   :  { %1164 = vst [vmem:[#allocation9 + $0x4] sm:$0x1] %v2612_v47  ;;  %v1167_v48 = vpack.c.bf16 %v2612_v47, %v2612_v47 }
 0x6c9   :  { %1201 = vmatmul.mubr.bf16.vlgmr.msra.gmra.mrb[24].mxu1 %v1167_v48  ;;  %1853 = vmatmul.mubr.bf16.vlgmr.msra.gmra.mrb[28].mxu0 %v1167_v48 }
 0x6ca   :  { %1281 = vmatpush1.bf16.msra.mxu1 %v2310_v58  ;;  %1857 = vmatpush3.bf16.msra.mxu0 %v2312_v59  ;;  %v1166_v58 = vld [vmem:[#allocation2 + $0x5] ss:$8 sm:$0x7] }
 0x6cb   :  { %1282 = vmatprep.subr.bf16.mxu1 %v2314_v62  ;;  %1858 = vmatprep.subr.bf16.mxu0 %v2195_v8  ;;  %v1268_v55 = vrot.slane %v1166_v58, 2 }
 0x6cc   :  { %1312 = vmatprep.mubr.bf16.mxu1 %v2192_v0  ;;  %1872 = vmatprep.mubr.msk.bf16.mxu0 %vm2194_vm0, %v2195_v8 }
 0x6ce   :  { %1283 = vmatpush1.bf16.msra.mxu1 %v2317_v63  ;;  %1859 = vmatpush3.bf16.msra.mxu0 %v2320_v1 }
 0x6cf   :  { %1284 = vmatprep.subr.bf16.mxu1 %v2323_v2  ;;  %1860 = vmatprep.subr.bf16.mxu0 %v2195_v8 }
 0x6d2   :  { %1285 = vmatpush1.bf16.msra.mxu1 %v2330_v3  ;;  %1861 = vmatpush3.bf16.msra.mxu0 %v2333_v4  ;;  %v1257_v3 = vrot.slane %v1166_v58, 1 }
 0x6d3   :  { %1286 = vmatprep.subr.bf16.mxu1 %v2336_v5  ;;  %1862 = vmatprep.subr.bf16.mxu0 %v2195_v8 }
 0x6d6   :  { %1287 = vmatpush1.bf16.msra.mxu1 %v2340_v6  ;;  %1863 = vmatpush3.bf16.msra.mxu0 %v2343_v7 }
 0x6d7   :  { %1288 = vmatprep.subr.bf16.mxu1 %v2346_v9  ;;  %1864 = vmatprep.subr.bf16.mxu0 %v2195_v8 }
 0x6da   :  { %1289 = vmatpush1.bf16.msra.mxu1 %v2350_v10  ;;  %1865 = vmatpush3.bf16.msra.mxu0 %v2353_v11 }
 0x6db   :  { %1290 = vmatprep.subr.bf16.mxu1 %v2356_v12  ;;  %1866 = vmatprep.subr.bf16.mxu0 %v2195_v8 }
 0x6de   :  { %1291 = vmatpush1.bf16.msra.mxu1 %v2360_v13  ;;  %1867 = vmatpush3.bf16.msra.mxu0 %v2363_v14 }
 0x6df   :  { %1292 = vmatprep.subr.bf16.mxu1 %v2366_v15  ;;  %1868 = vmatprep.subr.bf16.mxu0 %v2195_v8 }
 0x6e2   :  { %1293 = vmatpush1.bf16.msra.mxu1 %v2370_v16  ;;  %1869 = vmatpush3.bf16.msra.mxu0 %v2373_v17 }
 0x6e3   :  { %1294 = vmatprep.subr.bf16.mxu1 %v2376_v18  ;;  %1870 = vmatprep.subr.bf16.mxu0 %v2195_v8 }
 0x6e6   :  { %1295 = vmatpush1.bf16.msra.mxu1 %v2380_v19  ;;  %1871 = vmatpush3.bf16.msra.mxu0 %v2388_v21 }
 0x6e7   :  { %1392 = vmatprep.subr.bf16.mxu1 %v2306_v56  ;;  %1876 = vmatprep.subr.bf16.mxu0 %v2195_v8 }
 0x79c   :  { %v1202_v59 = vpop.f32.mrb[24].mxu1  ;;  %v1243_v62 = vpop.f32.mrb[28].mxu0 }
 0x79d   :  { %v1249_v63 = vadd.f32 %v1202_v59, %v1166_v58  ;;  %v1204_v1 = vpop.f32.mrb[25].mxu1  ;;  %v1854_v2 = vpop.f32.mrb[29].mxu0  ;;  %v1266_v53 = vadd.f32 %v1243_v62, %v2440_v27 }
 0x79e   :  { %v1206_v4 = vpop.f32.mrb[26].mxu1  ;;  %v1246_v5 = vpop.f32.mrb[30].mxu0  ;;  %v1259_v10 = vadd.f32 %v1257_v3, %v1204_v1 }
 0x79f   :  { %v1577_v6 = vmul.f32 -1.442695, %v1249_v63  ;;  %v1207_v7 = vpop.f32.mrb[27].mxu1  ;;  %v1855_v9 = vpop.f32.mrb[31].mxu0 }
 0x7a0   :  { %v1578_v49 = vmul.f32 -1.442695, %v1259_v10  ;;  %v1390_v7 = vld [vmem:[#allocation2 + $0x7] ss:$8 sm:$0x7] }
 0x7a1   :  { %2048 = vpow2.f32 %v1577_v6 }
 0x7a2   :  { %2050 = vpow2.f32 %v1578_v49 }
 0x7ab   :  { %v2049_v50 = vpop.eup %2048 }
 0x7ac   :  { %v1253_v56 = vadd.f32 1.0, %v2049_v50  ;;  %v2051_v51 = vpop.eup %2050 }
 0x7ad   :  { %v1263_v52 = vadd.f32 1.0, %v2051_v51  ;;  %v1481_v51 = vrot.slane %v1390_v7, 1 }
 0x7ae   :  { %2052 = vrcp.f32 %v1253_v56 }
 0x7af   :  { %2054 = vrcp.f32 %v1263_v52 }
 0x7b8   :  { %v2053_v54 = vpop.eup %2052 }
 0x7b9   :  { %v1267_v57 = vmul.f32 %v2053_v54, %v1266_v53  ;;  %v2055_v61 = vpop.eup %2054 }
 0x7ba   :  { %v1272_v22 = vsub.f32 1.0, %v2055_v61  ;;  %v1274_v26 = vmul.f32 %v2055_v61, %v2612_v47 }
 0x7bb   :  { %v1270_v60 = vadd.f32 %v1268_v55, %v1267_v57 }
 0x7bd   :  { %2056 = vtanh.f32 %v1270_v60 }
 0x7c7   :  { %v2057_v23 = vpop.eup %2056 }
 0x7c8   :  { %v1273_v24 = vmul.f32 %v2057_v23, %v1272_v22 }
 0x7ca   :  { %v2654_v29 = vadd.f32 %v1274_v26, %v1273_v24 }
 0x7cc   :  { %1276 = vst [vmem:[#allocation9 + $0x5] sm:$0x1] %v2654_v29  ;;  %v1279_v30 = vpack.c.bf16 %v2654_v29, %v2654_v29 }
 0x7ce   :  { %1313 = vmatmul.mubr.bf16.vlgmr.msra.gmra.mrb[28].mxu1 %v1279_v30  ;;  %1873 = vmatmul.mubr.bf16.vlgmr.msra.gmra.mrb[32].mxu0 %v1279_v30 }
 0x7cf   :  { %1393 = vmatpush1.bf16.msra.mxu1 %v2078_v31  ;;  %1877 = vmatpush3.bf16.msra.mxu0 %v2079_v32  ;;  %v1492_v31 = vrot.slane %v1390_v7, 2 }
 0x7d0   :  { %1394 = vmatprep.subr.bf16.mxu1 %v2080_v33  ;;  %1878 = vmatprep.subr.bf16.mxu0 %v2195_v8 }
 0x7d1   :  { %1424 = vmatprep.mubr.bf16.mxu1 %v2192_v0  ;;  %1892 = vmatprep.mubr.msk.bf16.mxu0 %vm2194_vm0, %v2195_v8  ;;  %v2087_v0 = vld [vmem:[#allocation8 + $0x48] ss:$12 sps:$4 sm:$0xff]  }
 0x7d3   :  { %1395 = vmatpush1.bf16.msra.mxu1 %v2081_v34  ;;  %1879 = vmatpush3.bf16.msra.mxu0 %v2082_v35 }
 0x7d4   :  { %1396 = vmatprep.subr.bf16.mxu1 %v2083_v36  ;;  %1880 = vmatprep.subr.bf16.mxu0 %v2195_v8 }
 0x7d7   :  { %1397 = vmatpush1.bf16.msra.mxu1 %v2084_v37  ;;  %1881 = vmatpush3.bf16.msra.mxu0 %v2085_v38 }
 0x7d8   :  { %1398 = vmatprep.subr.bf16.mxu1 %v2086_v39  ;;  %1882 = vmatprep.subr.bf16.mxu0 %v2195_v8 }
 0x7db   :  { %1399 = vmatpush1.bf16.msra.mxu1 %v2087_v0  ;;  %1883 = vmatpush3.bf16.msra.mxu0 %v2088_v40 }
 0x7dc   :  { %1400 = vmatprep.subr.bf16.mxu1 %v2089_v41  ;;  %1884 = vmatprep.subr.bf16.mxu0 %v2195_v8 }
 0x7df   :  { %1401 = vmatpush1.bf16.msra.mxu1 %v2090_v25  ;;  %1885 = vmatpush3.bf16.msra.mxu0 %v2353_v11  ;;  %v1278_v11 = vld [vmem:[#allocation2 + $0x6] ss:$8 sm:$0x7] }
 0x7e0   :  { %1402 = vmatprep.subr.bf16.mxu1 %v2356_v12  ;;  %1886 = vmatprep.subr.bf16.mxu0 %v2195_v8  ;;  %v1369_v28 = vrot.slane %v1278_v11, 1  ;;  %v1380_v58 = vrot.slane %v1278_v11, 2 }
 0x7e3   :  { %1403 = vmatpush1.bf16.msra.mxu1 %v2360_v13  ;;  %1887 = vmatpush3.bf16.msra.mxu0 %v2363_v14 }
 0x7e4   :  { %1404 = vmatprep.subr.bf16.mxu1 %v2366_v15  ;;  %1888 = vmatprep.subr.bf16.mxu0 %v2195_v8 }
 0x7e7   :  { %1405 = vmatpush1.bf16.msra.mxu1 %v2370_v16  ;;  %1889 = vmatpush3.bf16.msra.mxu0 %v2373_v17 }
 0x7e8   :  { %1406 = vmatprep.subr.bf16.mxu1 %v2376_v18  ;;  %1890 = vmatprep.subr.bf16.mxu0 %v2195_v8 }
 0x7eb   :  { %1407 = vmatpush1.bf16.msra.mxu1 %v2380_v19  ;;  %1891 = vmatpush3.bf16.msra.mxu0 %v2388_v21 }
 0x8a1   :  { %v1314_v12 = vpop.f32.mrb[28].mxu1  ;;  %v1355_v13 = vpop.f32.mrb[32].mxu0 }
 0x8a2   :  { %v1361_v14 = vadd.f32 %v1314_v12, %v1278_v11  ;;  %v1316_v20 = vpop.f32.mrb[29].mxu1  ;;  %v1874_v15 = vpop.f32.mrb[33].mxu0  ;;  %v1378_v47 = vadd.f32 %v1355_v13, %v2440_v27 }
 0x8a3   :  { %v1318_v42 = vpop.f32.mrb[30].mxu1  ;;  %v1358_v43 = vpop.f32.mrb[34].mxu0  ;;  %v1371_v45 = vadd.f32 %v1369_v28, %v1316_v20 }
 0x8a4   :  { %v1579_v16 = vmul.f32 -1.442695, %v1361_v14  ;;  %v1319_v44 = vpop.f32.mrb[31].mxu1  ;;  %v1875_v17 = vpop.f32.mrb[35].mxu0 }
 0x8a5   :  { %v1580_v18 = vmul.f32 -1.442695, %v1371_v45 }
 0x8a6   :  { %2058 = vpow2.f32 %v1579_v16 }
 0x8a7   :  { %2060 = vpow2.f32 %v1580_v18 }
 0x8b0   :  { %v2059_v8 = vpop.eup %2058 }
 0x8b1   :  { %v1365_v19 = vadd.f32 1.0, %v2059_v8  ;;  %v2061_v21 = vpop.eup %2060 }
 0x8b2   :  { %v1375_v46 = vadd.f32 1.0, %v2061_v21 }
 0x8b3   :  { %2062 = vrcp.f32 %v1365_v19 }
 0x8b4   :  { %2064 = vrcp.f32 %v1375_v46 }
 0x8bd   :  { %v2063_v48 = vpop.eup %2062 }
 0x8be   :  { %v1379_v59 = vmul.f32 %v2063_v48, %v1378_v47  ;;  %v2065_v63 = vpop.eup %2064 }
 0x8bf   :  { %v1384_v1 = vsub.f32 1.0, %v2065_v63  ;;  %v1386_v4 = vmul.f32 %v2065_v63, %v2654_v29 }
 0x8c0   :  { %v1382_v62 = vadd.f32 %v1380_v58, %v1379_v59 }
 0x8c2   :  { %2066 = vtanh.f32 %v1382_v62 }
 0x8cc   :  { %v2067_v2 = vpop.eup %2066 }
 0x8cd   :  { %v1385_v3 = vmul.f32 %v2067_v2, %v1384_v1 }
 0x8cf   :  { %v1387_v5 = vadd.f32 %v1386_v4, %v1385_v3 }
 0x8d1   :  { %1388 = vst [vmem:[#allocation9 + $0x6] sm:$0x1] %v1387_v5  ;;  %v1391_v6 = vpack.c.bf16 %v1387_v5, %v1387_v5 }
 0x8d3   :  { %1425 = vmatmul.mubr.bf16.vlgmr.msra.gmra.mrb[32].mxu1 %v1391_v6  ;;  %1893 = vmatmul.mubr.bf16.vlgmr.msra.gmra.mrb[36].mxu0 %v1391_v6 }
 0x9a6   :  { %v1426_v9 = vpop.f32.mrb[32].mxu1  ;;  %v1467_v10 = vpop.f32.mrb[36].mxu0 }
 0x9a7   :  { %v1473_v49 = vadd.f32 %v1426_v9, %v1390_v7  ;;  %v1428_v50 = vpop.f32.mrb[33].mxu1  ;;  %v1894_v56 = vpop.f32.mrb[37].mxu0  ;;  %v1490_v29 = vadd.f32 %v1467_v10, %v2440_v27 }
 0x9a8   :  { %v1430_v52 = vpop.f32.mrb[34].mxu1  ;;  %v1470_v53 = vpop.f32.mrb[38].mxu0  ;;  %v1483_v60 = vadd.f32 %v1481_v51, %v1428_v50 }
 0x9a9   :  { %v1581_v54 = vmul.f32 -1.442695, %v1473_v49  ;;  %v1431_v55 = vpop.f32.mrb[35].mxu1  ;;  %v1895_v57 = vpop.f32.mrb[39].mxu0 }
 0x9aa   :  { %v1582_v61 = vmul.f32 -1.442695, %v1483_v60 }
 0x9ab   :  { %2068 = vpow2.f32 %v1581_v54 }
 0x9ac   :  { %2070 = vpow2.f32 %v1582_v61 }
 0x9b5   :  { %v2069_v22 = vpop.eup %2068 }
 0x9b6   :  { %v1477_v23 = vadd.f32 1.0, %v2069_v22  ;;  %v2071_v24 = vpop.eup %2070 }
 0x9b7   :  { %v1487_v26 = vadd.f32 1.0, %v2071_v24 }
 0x9b8   :  { %2072 = vrcp.f32 %v1477_v23 }
 0x9b9   :  { %2074 = vrcp.f32 %v1487_v26 }
 0x9c2   :  { %v2073_v30 = vpop.eup %2072 }
 0x9c3   :  { %v1491_v32 = vmul.f32 %v2073_v30, %v1490_v29  ;;  %v2075_v34 = vpop.eup %2074 }
 0x9c4   :  { %v1496_v35 = vsub.f32 1.0, %v2075_v34  ;;  %v1498_v38 = vmul.f32 %v2075_v34, %v1387_v5 }
 0x9c5   :  { %v1494_v33 = vadd.f32 %v1492_v31, %v1491_v32 }
 0x9c7   :  { %2076 = vtanh.f32 %v1494_v33 }
 0x9d1   :  { %v2077_v36 = vpop.eup %2076 }
 0x9d2   :  { %v1497_v37 = vmul.f32 %v2077_v36, %v1496_v35 }
 0x9d4   :  { %v1499_v39 = vadd.f32 %v1498_v38, %v1497_v37 }
 0x9d6   :  { %1500 = vst [vmem:[#allocation9 + $0x7] sm:$0x1] %v1499_v39 }
 0x9d7   :  { %2168 = shalt.err (!%p2165_p0)
}
 0x9d8   :  { %s2169_s24 = scalar_lea.hbm %s2701_s7, 128 }
 0x9d9   :  { %p2170_p1 = scmp.ne.s32.totalorder %s2701_s7, %s2169_s24  ;;  %p2173_p2 = scmp.lt.u32.totalorder %s2169_s24, %s2701_s7 }
 0x9db   :  { %p2175_p3 = pnand %p2173_p2, %p2170_p1 }
 0x9dd   :  { %2178 = shalt.err (!%p2175_p3)
}
 0x9de   :  { %1510 = dma.vmem_to_hbm [thread:$0]  %s1508_s6, 128, %s2701_s7, [#allocation5]  }
 0x9df   :  { %2183 = dma.done.wait [#allocation5], 128  }
 0x9e0   :  { %2184 = vsyncadd [#allocation5], 4294967168 }
 0x9e1   :  { %1514 = vsyncpa [#allocation4], 1 }
 0x9e2   :  { %1515 = vsyncpa [#allocation7], 1 }
 0x9e3   :  { %1516 = vsyncpa [#allocation5], 1 }

</bundles_post_ra>
